<compile_context>
chip_gen: v6e
topology: v6e:2x2x1
jax: 0.10.0
libtpu: 0.0.40
codegen_flags: <defaults>
</compile_context>

<pallas_src>
import math
from functools import partial

import jax
import jax.numpy as jnp
from jax.experimental import pallas as pl
from jax.experimental.pallas import tpu as pltpu

_LANES = 128
_INV_SQRT2 = 1.0 / math.sqrt(2.0)
_BN_EPS = 1e-5


def _round_up(v, m):
    return (v + m - 1) // m * m


def _cube_root(n):
    r = int(round(n ** (1.0 / 3.0)))
    for cand in (r - 1, r, r + 1):
        if cand > 0 and cand * cand * cand == n:
            return cand
    raise ValueError(f"token count N={n} is not a perfect cube")


def _pick_vmem_limit():
    """~75% of physical VMEM per core: ~48 MiB on v7x, ~96 MiB on v5e/v6e."""
    cap = 64 * 1024 * 1024
    try:
        cap = int(pltpu.get_tpu_info().vmem_capacity_bytes)
    except Exception:
        pass
    return int(min(100 * 1024 * 1024, max(32 * 1024 * 1024, (cap * 3) // 4)))


_VMEM_LIMIT = _pick_vmem_limit()


def _pick_tz(n, n2, chp, requested=None):
    """z-planes per tile (must divide n)."""
    if requested is not None:
        tz = max(1, min(int(requested), n))
    else:
        budget = 4 * 1024 * 1024            # f32 bytes for the tile's own planes
        tz = max(1, min(n, budget // max(n2 * chp * 4, 1)))
    while n % tz:
        tz -= 1
    return tz


# --------------------- kernel A: fc1 + dwconv + BN partial stats --------------------- #
def _fc1_dwconv_kernel(x_ref, xlo_ref, xhi_ref, w1_ref, b1_ref, wd_ref, bd_ref,
                       m_ref, h_ref, stat_ref, buf_ref, *, n, tz, pad):
    """One (batch, z-tile) per grid step.

    fc1 (MXU) for the tile's TZ z-planes plus the +-1 halo planes -> staged
    into a VMEM scratch of (pad + (TZ+2)*n^2 + pad) rows -> 3x3x3 depthwise
    conv evaluated one output z-plane at a time with taps grouped by (ky,kx)
    and a single precomputed boundary-mask multiply per group -> bf16 conv
    output + per-tile BatchNorm sum / sum-of-squares partials.
    """
    f32 = jnp.float32
    n2 = n * n
    chp = h_ref.shape[-1]
    t = pl.program_id(1)
    last_t = pl.num_programs(1) - 1

    w1 = w1_ref[...]                 # (c_in, chp)
    b1 = b1_ref[...]                 # (1, chp)
    wd = wd_ref[...]                 # (27, chp), rows ordered (ky, kx, kz)
    bd = bd_ref[...]                 # (1, chp)
    msk = m_ref[...]                 # (n2, 9) f32 y/x boundary masks per (ky,kx)

    # Small guard bands above/below the staged planes: masked out-of-plane tap
    # reads land here and must be finite (mask * garbage could be NaN).
    buf_ref[0:pad, :] = jnp.zeros((pad, chp), f32)
    top = pad + (tz + 2) * n2
    buf_ref[top:top + pad, :] = jnp.zeros((pad, chp), f32)

    # fc1 for the +-1 z-plane halo.  At the volume boundary the halo plane is
    # zeroed, reproducing Conv3d's zero padding along z.
    lo = jnp.dot(xlo_ref[0], w1, preferred_element_type=f32) + b1
    hi = jnp.dot(xhi_ref[0], w1, preferred_element_type=f32) + b1
    lo = lo * jnp.where(t == 0, 0.0, 1.0)
    hi = hi * jnp.where(t == last_t, 0.0, 1.0)
    buf_ref[pad:pad + n2, :] = lo
    buf_ref[pad + (tz + 1) * n2:pad + (tz + 2) * n2, :] = hi

    # fc1 for the TZ z-planes owned by this tile (one MXU matmul).
    buf_ref[pad + n2:pad + (tz + 1) * n2, :] = (
        jnp.dot(x_ref[0], w1, preferred_element_type=f32) + b1)

    # Depthwise 3x3x3 conv, one output z-plane at a time.
    s_acc = jnp.zeros((1, chp), f32)
    q_acc = jnp.zeros((1, chp), f32)
    for zi in range(tz):
        base = pad + (zi + 1) * n2               # start row of the centre plane
        acc = jnp.zeros((n2, chp), f32)
        for ky in range(3):
            for kx in range(3):
                g = ky * 3 + kx
                dyx = (ky - 1) * n + (kx - 1)
                part = jnp.zeros((n2, chp), f32)
                for kz in range(3):              # unmasked z-taps of this group
                    r0 = base + (kz - 1) * n2 + dyx
                    w_row = wd[g * 3 + kz:g * 3 + kz + 1, :]
                    part = part + buf_ref[r0:r0 + n2, :] * w_row
                if ky == 1 and kx == 1:          # centre group never masked
                    acc = acc + part
                else:                            # one mask multiply per group
                    acc = acc + part * msk[:, g:g + 1]
        acc = acc + bd
        h_ref[0, zi * n2:(zi + 1) * n2, :] = acc.astype(h_ref.dtype)
        # Single-pass BatchNorm partials from the f32 accumulator.
        s_acc = s_acc + jnp.sum(acc, axis=0, keepdims=True)
        q_acc = q_acc + jnp.sum(acc * acc, axis=0, keepdims=True)

    stat_ref[0, 0:1, :] = s_acc
    stat_ref[0, 1:2, :] = q_acc
    stat_ref[0, 2:8, :] = jnp.zeros((6, chp), f32)


# --------------------- kernel B: BN affine + GELU + fc2 --------------------- #
def _bn_gelu_fc2_kernel(h_ref, sc_ref, sh_ref, w2_ref, b2_ref, o_ref):
    """One (batch, z-tile) per grid step: folded BatchNorm affine -> exact
    (erf) GELU -> fc2 on the MXU.  Dropout(p=0) is the identity."""
    y = h_ref[0].astype(jnp.float32) * sc_ref[...] + sh_ref[...]
    y = 0.5 * y * (1.0 + jax.lax.erf(y * _INV_SQRT2))
    out = jnp.dot(y, w2_ref[...], preferred_element_type=jnp.float32) + b2_ref[...]
    o_ref[0] = out.astype(o_ref.dtype)


# ------------------------------------ wrapper ------------------------------------ #
def mlp_forward(x, W1, b1, Wd, bd, gamma, beta, W2, b2, *, tz=None):
    """x: (B, N, C_in) with N = n^3.  PyTorch parameter shapes:
       W1: (C_hid, C_in), b1: (C_hid,), Wd: (C_hid, 1, 3, 3, 3), bd: (C_hid,),
       gamma/beta: (C_hid,), W2: (C_in, C_hid), b2: (C_in,)."""
    B, N, c_in = x.shape
    n = _cube_root(N)
    n2 = n * n
    c_hid = W1.shape[0]
    chp = _round_up(c_hid, _LANES)           # lane-dense hidden channel width
    pad_h = chp - c_hid
    f32 = jnp.float32

    tz = _pick_tz(n, n2, chp, tz)            # z-planes per tile
    n_zt = n // tz
    tn = tz * n2                             # tokens per tile
    pad = _round_up(n + 1, 8)                # sub-plane guard band (sublane aligned)

    # fc1 parameters, transposed and lane-padded (pad channels are all-zero).
    w1t = jnp.pad(W1.astype(f32).T, ((0, 0), (0, pad_h)))            # (c_in, chp)
    b1p = jnp.pad(b1.astype(f32), (0, pad_h)).reshape(1, chp)
    # Depthwise filter flattened to (27, chp) with rows ordered (ky, kx, kz).
    wd = jnp.transpose(Wd[:, 0].astype(f32), (2, 3, 1, 0)).reshape(27, c_hid)
    wdp = jnp.pad(wd, ((0, 0), (0, pad_h)))
    bdp = jnp.pad(bd.astype(f32), (0, pad_h)).reshape(1, chp)
    # fc2 parameters: zero rows for the padded hidden channels.
    w2t = jnp.pad(W2.astype(f32).T, ((0, pad_h), (0, 0)))            # (chp, c_in)
    b2p = b2.astype(f32).reshape(1, c_in)

    # Precomputed per-token y/x boundary masks, one column per (ky,kx) group.
    p = jnp.arange(n2, dtype=jnp.int32)
    yy, xx = p // n, p % n
    cols = []
    for ky in range(3):
        for kx in range(3):
            dy, dx = ky - 1, kx - 1
            oky = jnp.logical_and(yy + dy >= 0, yy + dy <= n - 1)
            okx = jnp.logical_and(xx + dx >= 0, xx + dx <= n - 1)
            cols.append(jnp.logical_and(oky, okx).astype(f32))
    mask = jnp.stack(cols, axis=1)                                   # (n2, 9)

    cparams = pltpu.CompilerParams(
        dimension_semantics=("parallel", "parallel"),
        vmem_limit_bytes=_VMEM_LIMIT)

    # ---- kernel A: fc1 + depthwise conv + per-tile BN statistics ----
    itemsize_x = x.dtype.itemsize
    bytes_a = int(B * N * c_in * itemsize_x * (1 + 2.0 / tz)
                  + (w1t.size + b1p.size + wdp.size + bdp.size + mask.size) * 4
                  + B * N * chp * 2 + B * n_zt * 8 * chp * 4)
    flops_a = int(2 * B * (N + 2 * n_zt * n2) * c_in * chp
                  + 2 * B * N * 27 * chp + B * N * 9 * chp)
    cost_a = pl.CostEstimate(flops=flops_a, transcendentals=0,
                             bytes_accessed=bytes_a)

    h, stat = pl.pallas_call(
        partial(_fc1_dwconv_kernel, n=n, tz=tz, pad=pad),
        out_shape=(
            jax.ShapeDtypeStruct((B, N, chp), jnp.bfloat16),   # conv output (pre-BN)
            jax.ShapeDtypeStruct((B, n_zt * 8, chp), f32),     # per-tile BN partials
        ),
        grid=(B, n_zt),
        in_specs=[
            pl.BlockSpec((1, tn, c_in), lambda b, t: (b, t, 0)),
            # +-1 z-plane halos; block size = one plane, index = clamped plane id.
            pl.BlockSpec((1, n2, c_in),
                         lambda b, t: (b, jnp.maximum(t * tz - 1, 0), 0)),
            pl.BlockSpec((1, n2, c_in),
                         lambda b, t: (b, jnp.minimum(t * tz + tz, n - 1), 0)),
            pl.BlockSpec((c_in, chp), lambda b, t: (0, 0)),
            pl.BlockSpec((1, chp), lambda b, t: (0, 0)),
            pl.BlockSpec((27, chp), lambda b, t: (0, 0)),
            pl.BlockSpec((1, chp), lambda b, t: (0, 0)),
            pl.BlockSpec((n2, 9), lambda b, t: (0, 0)),
        ],
        out_specs=(
            pl.BlockSpec((1, tn, chp), lambda b, t: (b, t, 0)),
            pl.BlockSpec((1, 8, chp), lambda b, t: (b, t, 0)),
        ),
        scratch_shapes=[pltpu.VMEM((2 * pad + (tz + 2) * n2, chp), f32)],
        compiler_params=cparams,
        cost_estimate=cost_a,
    )(x, x, x, w1t, b1p, wdp, bdp, mask)

    # ---- BatchNorm3d batch statistics (training-mode forward: biased batch
    # variance, eps=1e-5), finalized across all (batch, tile) partials so the
    # normalization is the global (B, D, H, W) statistic.
    stats = stat.reshape(B, n_zt, 8, chp)
    cnt = float(B * N)
    mean = jnp.sum(stats[:, :, 0, :], axis=(0, 1)) / cnt
    ex2 = jnp.sum(stats[:, :, 1, :], axis=(0, 1)) / cnt
    var = jnp.maximum(ex2 - mean * mean, 0.0)
    inv = jax.lax.rsqrt(var + _BN_EPS)
    gam = jnp.pad(gamma.astype(f32), (0, pad_h))
    bet = jnp.pad(beta.astype(f32), (0, pad_h))
    scale = (gam * inv).reshape(1, chp)
    shift = (bet - mean * gam * inv).reshape(1, chp)

    # ---- kernel B: folded BN affine + GELU + fc2 ----
    bytes_b = int(B * N * chp * 2 + (2 * chp + w2t.size + b2p.size) * 4
                  + B * N * c_in * itemsize_x)
    cost_b = pl.CostEstimate(
        flops=int(2 * B * N * chp * c_in + 10 * B * N * chp),
        transcendentals=int(B * N * chp),
        bytes_accessed=bytes_b)

    out = pl.pallas_call(
        _bn_gelu_fc2_kernel,
        out_shape=jax.ShapeDtypeStruct((B, N, c_in), x.dtype),
        grid=(B, n_zt),
        in_specs=[
            pl.BlockSpec((1, tn, chp), lambda b, t: (b, t, 0)),
            pl.BlockSpec((1, chp), lambda b, t: (0, 0)),
            pl.BlockSpec((1, chp), lambda b, t: (0, 0)),
            pl.BlockSpec((chp, c_in), lambda b, t: (0, 0)),
            pl.BlockSpec((1, c_in), lambda b, t: (0, 0)),
        ],
        out_specs=pl.BlockSpec((1, tn, c_in), lambda b, t: (b, t, 0)),
        compiler_params=cparams,
        cost_estimate=cost_b,
    )(h, scale, shift, w2t, b2p)
    return out


if __name__ == "__main__":
    B, n, c_in = 2, 4, 16
    N = n ** 3                      # 64 tokens
    c_hid = 2 * c_in                # mlp_ratio = 2

    key = jax.random.PRNGKey(0)
    ks = jax.random.split(key, 9)
    x = jax.random.normal(ks[0], (B, N, c_in), jnp.float32)

    # Deterministic synthetic parameters (PyTorch shapes).
    W1 = 0.1 * jax.random.normal(ks[1], (c_hid, c_in), jnp.float32)
    b1 = 0.1 * jax.random.normal(ks[2], (c_hid,), jnp.float32)
    Wd = 0.1 * jax.random.normal(ks[3], (c_hid, 1, 3, 3, 3), jnp.float32)
    bd = 0.1 * jax.random.normal(ks[4], (c_hid,), jnp.float32)
    gamma = 1.0 + 0.1 * jax.random.normal(ks[5], (c_hid,), jnp.float32)
    beta = 0.1 * jax.random.normal(ks[6], (c_hid,), jnp.float32)
    W2 = 0.1 * jax.random.normal(ks[7], (c_in, c_hid), jnp.float32)
    b2 = 0.1 * jax.random.normal(ks[8], (c_in,), jnp.float32)

    fwd = jax.jit(mlp_forward, static_argnames=("tz",))
    # tz=2 -> two z-plane tiles per batch element, exercising the halo path.
    out = fwd(x, W1, b1, Wd, bd, gamma, beta, W2, b2, tz=2)
    jax.block_until_ready(out)
    assert out.shape == (B, N, c_in) and out.dtype == jnp.float32
    assert bool(jnp.all(jnp.isfinite(out)))
    print("KERNEL_OK")
</pallas_src>

<mosaic_0001>
module attributes {stable_mosaic.version = 11 : i64} {
  func.func @_bn_gelu_fc2_kernel(%arg0: i32, %arg1: i32, %arg2: memref<1x32x128xbf16, #tpu.memory_space<vmem>>, %arg3: memref<1x128xf32, #tpu.memory_space<vmem>>, %arg4: memref<1x128xf32, #tpu.memory_space<vmem>>, %arg5: memref<128x16xf32, #tpu.memory_space<vmem>>, %arg6: memref<1x16xf32, #tpu.memory_space<vmem>>, %arg7: memref<1x32x16xf32, #tpu.memory_space<vmem>>) attributes {dimension_semantics = [#tpu.dimension_semantics<parallel>, #tpu.dimension_semantics<parallel>], iteration_bounds = array<i64: 2, 2>, scalar_prefetch = 0 : i64, scratch_operands = 0 : i64, tpu.core_type = #tpu.core_type<tc>, window_params = [{transform_indices = @transform_0, window_bounds = array<i64: 1, 32, 128>}, {pipeline_mode = #tpu.pipeline_mode<synchronous>, transform_indices = @transform_1, window_bounds = array<i64: 1, 128>}, {pipeline_mode = #tpu.pipeline_mode<synchronous>, transform_indices = @transform_2, window_bounds = array<i64: 1, 128>}, {pipeline_mode = #tpu.pipeline_mode<synchronous>, transform_indices = @transform_3, window_bounds = array<i64: 128, 16>}, {pipeline_mode = #tpu.pipeline_mode<synchronous>, transform_indices = @transform_4, window_bounds = array<i64: 1, 16>}, {transform_indices = @transform_5, window_bounds = array<i64: 1, 32, 16>}]} {
    %c0 = arith.constant 0 : index
    %c0_0 = arith.constant 0 : index
    %c0_1 = arith.constant 0 : index
    %0 = vector.load %arg2[%c0, %c0_0, %c0_1] : memref<1x32x128xbf16, #tpu.memory_space<vmem>>, vector<1x32x128xbf16>
    %1 = vector.shape_cast %0 : vector<1x32x128xbf16> to vector<32x128xbf16>
    %2 = arith.extf %1 : vector<32x128xbf16> to vector<32x128xf32>
    %c0_2 = arith.constant 0 : index
    %c0_3 = arith.constant 0 : index
    %3 = vector.load %arg3[%c0_2, %c0_3] : memref<1x128xf32, #tpu.memory_space<vmem>>, vector<1x128xf32>
    %4 = vector.broadcast %3 : vector<1x128xf32> to vector<32x128xf32>
    %5 = arith.mulf %2, %4 : vector<32x128xf32>
    %c0_4 = arith.constant 0 : index
    %c0_5 = arith.constant 0 : index
    %6 = vector.load %arg4[%c0_4, %c0_5] : memref<1x128xf32, #tpu.memory_space<vmem>>, vector<1x128xf32>
    %7 = vector.broadcast %6 : vector<1x128xf32> to vector<32x128xf32>
    %8 = arith.addf %5, %7 : vector<32x128xf32>
    %cst = arith.constant 5.000000e-01 : f32
    %9 = vector.broadcast %cst : f32 to vector<32x128xf32>
    %10 = arith.mulf %9, %8 : vector<32x128xf32>
    %cst_6 = arith.constant 0.707106769 : f32
    %11 = vector.broadcast %cst_6 : f32 to vector<32x128xf32>
    %12 = arith.mulf %8, %11 : vector<32x128xf32>
    %13 = math.erf %12 : vector<32x128xf32>
    %cst_7 = arith.constant 1.000000e+00 : f32
    %14 = vector.broadcast %cst_7 : f32 to vector<32x128xf32>
    %15 = arith.addf %14, %13 : vector<32x128xf32>
    %16 = arith.mulf %10, %15 : vector<32x128xf32>
    %c0_8 = arith.constant 0 : index
    %c0_9 = arith.constant 0 : index
    %17 = vector.load %arg5[%c0_8, %c0_9] : memref<128x16xf32, #tpu.memory_space<vmem>>, vector<128x16xf32>
    %cst_10 = arith.constant dense<0.000000e+00> : vector<32x16xf32>
    %18 = tpu.matmul %16, %17, %cst_10 {dimension_numbers = #tpu.dot_dimension_numbers<[1], [0], [0], [1], [0, 0, 1, 1], [], []>} : vector<32x128xf32>, vector<128x16xf32>, vector<32x16xf32> -> vector<32x16xf32>
    %c0_11 = arith.constant 0 : index
    %c0_12 = arith.constant 0 : index
    %19 = vector.load %arg6[%c0_11, %c0_12] : memref<1x16xf32, #tpu.memory_space<vmem>>, vector<1x16xf32>
    %20 = vector.broadcast %19 : vector<1x16xf32> to vector<32x16xf32>
    %21 = arith.addf %18, %20 : vector<32x16xf32>
    %c0_13 = arith.constant 0 : index
    %c0_14 = arith.constant 0 : index
    %c0_15 = arith.constant 0 : index
    %22 = vector.load %arg7[%c0_13, %c0_14, %c0_15] : memref<1x32x16xf32, #tpu.memory_space<vmem>>, vector<1x32x16xf32>
    %23 = vector.shape_cast %22 : vector<1x32x16xf32> to vector<32x16xf32>
    %24 = vector.shape_cast %21 : vector<32x16xf32> to vector<1x32x16xf32>
    tpu.vector_store %arg7[%c0_13, %c0_14, %c0_15], %24 {strides = array<i32>} : memref<1x32x16xf32, #tpu.memory_space<vmem>>, vector<1x32x16xf32>,
    return
  }
  func.func @transform_0(%arg0: i32, %arg1: i32) -> (i32, i32, i32) {
    %c0_i32 = arith.constant 0 : i32
    %c0_i32_0 = arith.constant 0 : i32
    return %arg0, %arg1, %c0_i32 : i32, i32, i32
  }
  func.func @transform_1(%arg0: i32, %arg1: i32) -> (i32, i32) {
    %c0_i32 = arith.constant 0 : i32
    %c0_i32_0 = arith.constant 0 : i32
    %c0_i32_1 = arith.constant 0 : i32
    return %c0_i32, %c0_i32_0 : i32, i32
  }
  func.func @transform_2(%arg0: i32, %arg1: i32) -> (i32, i32) {
    %c0_i32 = arith.constant 0 : i32
    %c0_i32_0 = arith.constant 0 : i32
    %c0_i32_1 = arith.constant 0 : i32
    return %c0_i32, %c0_i32_0 : i32, i32
  }
  func.func @transform_3(%arg0: i32, %arg1: i32) -> (i32, i32) {
    %c0_i32 = arith.constant 0 : i32
    %c0_i32_0 = arith.constant 0 : i32
    %c0_i32_1 = arith.constant 0 : i32
    return %c0_i32, %c0_i32_0 : i32, i32
  }
  func.func @transform_4(%arg0: i32, %arg1: i32) -> (i32, i32) {
    %c0_i32 = arith.constant 0 : i32
    %c0_i32_0 = arith.constant 0 : i32
    %c0_i32_1 = arith.constant 0 : i32
    return %c0_i32, %c0_i32_0 : i32, i32
  }
  func.func @transform_5(%arg0: i32, %arg1: i32) -> (i32, i32, i32) {
    %c0_i32 = arith.constant 0 : i32
    %c0_i32_0 = arith.constant 0 : i32
    return %arg0, %arg1, %c0_i32 : i32, i32, i32
  }
}

module attributes {stable_mosaic.version = 11 : i64} {
  func.func @_fc1_dwconv_kernel(%arg0: i32, %arg1: i32, %arg2: memref<1x32x16xf32, #tpu.memory_space<vmem>>, %arg3: memref<1x16x16xf32, #tpu.memory_space<vmem>>, %arg4: memref<1x16x16xf32, #tpu.memory_space<vmem>>, %arg5: memref<16x128xf32, #tpu.memory_space<vmem>>, %arg6: memref<1x128xf32, #tpu.memory_space<vmem>>, %arg7: memref<27x128xf32, #tpu.memory_space<vmem>>, %arg8: memref<1x128xf32, #tpu.memory_space<vmem>>, %arg9: memref<16x9xf32, #tpu.memory_space<vmem>>, %arg10: memref<1x32x128xbf16, #tpu.memory_space<vmem>>, %arg11: memref<1x8x128xf32, #tpu.memory_space<vmem>>, %arg12: memref<80x128xf32, #tpu.memory_space<vmem>>) attributes {dimension_semantics = [#tpu.dimension_semantics<parallel>, #tpu.dimension_semantics<parallel>], iteration_bounds = array<i64: 2, 2>, scalar_prefetch = 0 : i64, scratch_operands = 1 : i64, tpu.core_type = #tpu.core_type<tc>, window_params = [{transform_indices = @transform_0, window_bounds = array<i64: 1, 32, 16>}, {transform_indices = @transform_1, window_bounds = array<i64: 1, 16, 16>}, {transform_indices = @transform_2, window_bounds = array<i64: 1, 16, 16>}, {pipeline_mode = #tpu.pipeline_mode<synchronous>, transform_indices = @transform_3, window_bounds = array<i64: 16, 128>}, {pipeline_mode = #tpu.pipeline_mode<synchronous>, transform_indices = @transform_4, window_bounds = array<i64: 1, 128>}, {pipeline_mode = #tpu.pipeline_mode<synchronous>, transform_indices = @transform_5, window_bounds = array<i64: 27, 128>}, {pipeline_mode = #tpu.pipeline_mode<synchronous>, transform_indices = @transform_6, window_bounds = array<i64: 1, 128>}, {pipeline_mode = #tpu.pipeline_mode<synchronous>, transform_indices = @transform_7, window_bounds = array<i64: 16, 9>}, {transform_indices = @transform_8, window_bounds = array<i64: 1, 32, 128>}, {transform_indices = @transform_9, window_bounds = array<i64: 1, 8, 128>}]} {
    %c0 = arith.constant 0 : index
    %c0_0 = arith.constant 0 : index
    %0 = vector.load %arg5[%c0, %c0_0] : memref<16x128xf32, #tpu.memory_space<vmem>>, vector<16x128xf32>
    %c0_1 = arith.constant 0 : index
    %c0_2 = arith.constant 0 : index
    %1 = vector.load %arg6[%c0_1, %c0_2] : memref<1x128xf32, #tpu.memory_space<vmem>>, vector<1x128xf32>
    %c0_3 = arith.constant 0 : index
    %c0_4 = arith.constant 0 : index
    %2 = vector.load %arg7[%c0_3, %c0_4] : memref<27x128xf32, #tpu.memory_space<vmem>>, vector<27x128xf32>
    %c0_5 = arith.constant 0 : index
    %c0_6 = arith.constant 0 : index
    %3 = vector.load %arg8[%c0_5, %c0_6] : memref<1x128xf32, #tpu.memory_space<vmem>>, vector<1x128xf32>
    %c0_7 = arith.constant 0 : index
    %c0_8 = arith.constant 0 : index
    %4 = vector.load %arg9[%c0_7, %c0_8] : memref<16x9xf32, #tpu.memory_space<vmem>>, vector<16x9xf32>
    %cst = arith.constant 0.000000e+00 : f32
    %5 = vector.broadcast %cst : f32 to vector<8x128xf32>
    %c0_9 = arith.constant 0 : index
    %c0_10 = arith.constant 0 : index
    %6 = vector.load %arg12[%c0_9, %c0_10] : memref<80x128xf32, #tpu.memory_space<vmem>>, vector<8x128xf32>
    tpu.vector_store %arg12[%c0_9, %c0_10], %5 {strides = array<i32>} : memref<80x128xf32, #tpu.memory_space<vmem>>, vector<8x128xf32>,
    %cst_11 = arith.constant 0.000000e+00 : f32
    %7 = vector.broadcast %cst_11 : f32 to vector<8x128xf32>
    %c72 = arith.constant 72 : index
    %c0_12 = arith.constant 0 : index
    %8 = vector.load %arg12[%c72, %c0_12] : memref<80x128xf32, #tpu.memory_space<vmem>>, vector<8x128xf32>
    tpu.vector_store %arg12[%c72, %c0_12], %7 {strides = array<i32>} : memref<80x128xf32, #tpu.memory_space<vmem>>, vector<8x128xf32>,
    %c0_13 = arith.constant 0 : index
    %c0_14 = arith.constant 0 : index
    %c0_15 = arith.constant 0 : index
    %9 = vector.load %arg3[%c0_13, %c0_14, %c0_15] : memref<1x16x16xf32, #tpu.memory_space<vmem>>, vector<1x16x16xf32>
    %10 = vector.shape_cast %9 : vector<1x16x16xf32> to vector<16x16xf32>
    %cst_16 = arith.constant dense<0.000000e+00> : vector<16x128xf32>
    %11 = tpu.matmul %10, %0, %cst_16 {dimension_numbers = #tpu.dot_dimension_numbers<[1], [0], [0], [1], [0, 0, 1, 1], [], []>} : vector<16x16xf32>, vector<16x128xf32>, vector<16x128xf32> -> vector<16x128xf32>
    %12 = vector.broadcast %1 : vector<1x128xf32> to vector<16x128xf32>
    %13 = arith.addf %11, %12 : vector<16x128xf32>
    %c0_17 = arith.constant 0 : index
    %c0_18 = arith.constant 0 : index
    %c0_19 = arith.constant 0 : index
    %14 = vector.load %arg4[%c0_17, %c0_18, %c0_19] : memref<1x16x16xf32, #tpu.memory_space<vmem>>, vector<1x16x16xf32>
    %15 = vector.shape_cast %14 : vector<1x16x16xf32> to vector<16x16xf32>
    %cst_20 = arith.constant dense<0.000000e+00> : vector<16x128xf32>
    %16 = tpu.matmul %15, %0, %cst_20 {dimension_numbers = #tpu.dot_dimension_numbers<[1], [0], [0], [1], [0, 0, 1, 1], [], []>} : vector<16x16xf32>, vector<16x128xf32>, vector<16x128xf32> -> vector<16x128xf32>
    %17 = vector.broadcast %1 : vector<1x128xf32> to vector<16x128xf32>
    %18 = arith.addf %16, %17 : vector<16x128xf32>
    %c0_i32 = arith.constant 0 : i32
    %19 = arith.cmpi eq, %arg1, %c0_i32 : i32
    %cst_21 = arith.constant 0.000000e+00 : f32
    %cst_22 = arith.constant 1.000000e+00 : f32
    %20 = arith.select %19, %cst_21, %cst_22 : f32
    %21 = vector.broadcast %20 : f32 to vector<16x128xf32>
    %22 = arith.mulf %13, %21 : vector<16x128xf32>
    %c1_i32 = arith.constant 1 : i32
    %23 = arith.cmpi eq, %arg1, %c1_i32 : i32
    %cst_23 = arith.constant 0.000000e+00 : f32
    %cst_24 = arith.constant 1.000000e+00 : f32
    %24 = arith.select %23, %cst_23, %cst_24 : f32
    %25 = vector.broadcast %24 : f32 to vector<16x128xf32>
    %26 = arith.mulf %18, %25 : vector<16x128xf32>
    %c8 = arith.constant 8 : index
    %c0_25 = arith.constant 0 : index
    %27 = vector.load %arg12[%c8, %c0_25] : memref<80x128xf32, #tpu.memory_space<vmem>>, vector<16x128xf32>
    tpu.vector_store %arg12[%c8, %c0_25], %22 {strides = array<i32>} : memref<80x128xf32, #tpu.memory_space<vmem>>, vector<16x128xf32>,
    %c56 = arith.constant 56 : index
    %c0_26 = arith.constant 0 : index
    %28 = vector.load %arg12[%c56, %c0_26] : memref<80x128xf32, #tpu.memory_space<vmem>>, vector<16x128xf32>
    tpu.vector_store %arg12[%c56, %c0_26], %26 {strides = array<i32>} : memref<80x128xf32, #tpu.memory_space<vmem>>, vector<16x128xf32>,
    %c0_27 = arith.constant 0 : index
    %c0_28 = arith.constant 0 : index
    %c0_29 = arith.constant 0 : index
    %29 = vector.load %arg2[%c0_27, %c0_28, %c0_29] : memref<1x32x16xf32, #tpu.memory_space<vmem>>, vector<1x32x16xf32>
    %30 = vector.shape_cast %29 : vector<1x32x16xf32> to vector<32x16xf32>
    %cst_30 = arith.constant dense<0.000000e+00> : vector<32x128xf32>
    %31 = tpu.matmul %30, %0, %cst_30 {dimension_numbers = #tpu.dot_dimension_numbers<[1], [0], [0], [1], [0, 0, 1, 1], [], []>} : vector<32x16xf32>, vector<16x128xf32>, vector<32x128xf32> -> vector<32x128xf32>
    %32 = vector.broadcast %1 : vector<1x128xf32> to vector<32x128xf32>
    %33 = arith.addf %31, %32 : vector<32x128xf32>
    %c24 = arith.constant 24 : index
    %c0_31 = arith.constant 0 : index
    %34 = vector.load %arg12[%c24, %c0_31] : memref<80x128xf32, #tpu.memory_space<vmem>>, vector<32x128xf32>
    tpu.vector_store %arg12[%c24, %c0_31], %33 {strides = array<i32>} : memref<80x128xf32, #tpu.memory_space<vmem>>, vector<32x128xf32>,
    %cst_32 = arith.constant 0.000000e+00 : f32
    %35 = vector.broadcast %cst_32 : f32 to vector<1x128xf32>
    %cst_33 = arith.constant 0.000000e+00 : f32
    %36 = vector.broadcast %cst_33 : f32 to vector<1x128xf32>
    %cst_34 = arith.constant 0.000000e+00 : f32
    %37 = vector.broadcast %cst_34 : f32 to vector<16x128xf32>
    %cst_35 = arith.constant 0.000000e+00 : f32
    %38 = vector.broadcast %cst_35 : f32 to vector<16x128xf32>
    %39 = vector.extract_strided_slice %2 {offsets = [0, 0], sizes = [1, 128], strides = [1, 1]} : vector<27x128xf32> to vector<1x128xf32>
    %c3 = arith.constant 3 : index
    %c0_36 = arith.constant 0 : index
    %40 = vector.load %arg12[%c3, %c0_36] : memref<80x128xf32, #tpu.memory_space<vmem>>, vector<16x128xf32>
    %41 = vector.broadcast %39 : vector<1x128xf32> to vector<16x128xf32>
    %42 = arith.mulf %40, %41 : vector<16x128xf32>
    %43 = arith.addf %38, %42 : vector<16x128xf32>
    %44 = vector.extract_strided_slice %2 {offsets = [1, 0], sizes = [1, 128], strides = [1, 1]} : vector<27x128xf32> to vector<1x128xf32>
    %c19 = arith.constant 19 : index
    %c0_37 = arith.constant 0 : index
    %45 = vector.load %arg12[%c19, %c0_37] : memref<80x128xf32, #tpu.memory_space<vmem>>, vector<16x128xf32>
    %46 = vector.broadcast %44 : vector<1x128xf32> to vector<16x128xf32>
    %47 = arith.mulf %45, %46 : vector<16x128xf32>
    %48 = arith.addf %43, %47 : vector<16x128xf32>
    %49 = vector.extract_strided_slice %2 {offsets = [2, 0], sizes = [1, 128], strides = [1, 1]} : vector<27x128xf32> to vector<1x128xf32>
    %c35 = arith.constant 35 : index
    %c0_38 = arith.constant 0 : index
    %50 = vector.load %arg12[%c35, %c0_38] : memref<80x128xf32, #tpu.memory_space<vmem>>, vector<16x128xf32>
    %51 = vector.broadcast %49 : vector<1x128xf32> to vector<16x128xf32>
    %52 = arith.mulf %50, %51 : vector<16x128xf32>
    %53 = arith.addf %48, %52 : vector<16x128xf32>
    %54 = vector.extract_strided_slice %4 {offsets = [0, 0], sizes = [16, 1], strides = [1, 1]} : vector<16x9xf32> to vector<16x1xf32>
    %55 = vector.broadcast %54 : vector<16x1xf32> to vector<16x128xf32>
    %56 = arith.mulf %53, %55 : vector<16x128xf32>
    %57 = arith.addf %37, %56 : vector<16x128xf32>
    %cst_39 = arith.constant 0.000000e+00 : f32
    %58 = vector.broadcast %cst_39 : f32 to vector<16x128xf32>
    %59 = vector.extract_strided_slice %2 {offsets = [3, 0], sizes = [1, 128], strides = [1, 1]} : vector<27x128xf32> to vector<1x128xf32>
    %c4 = arith.constant 4 : index
    %c0_40 = arith.constant 0 : index
    %60 = vector.load %arg12[%c4, %c0_40] : memref<80x128xf32, #tpu.memory_space<vmem>>, vector<16x128xf32>
    %61 = vector.broadcast %59 : vector<1x128xf32> to vector<16x128xf32>
    %62 = arith.mulf %60, %61 : vector<16x128xf32>
    %63 = arith.addf %58, %62 : vector<16x128xf32>
    %64 = vector.extract_strided_slice %2 {offsets = [4, 0], sizes = [1, 128], strides = [1, 1]} : vector<27x128xf32> to vector<1x128xf32>
    %c20 = arith.constant 20 : index
    %c0_41 = arith.constant 0 : index
    %65 = vector.load %arg12[%c20, %c0_41] : memref<80x128xf32, #tpu.memory_space<vmem>>, vector<16x128xf32>
    %66 = vector.broadcast %64 : vector<1x128xf32> to vector<16x128xf32>
    %67 = arith.mulf %65, %66 : vector<16x128xf32>
    %68 = arith.addf %63, %67 : vector<16x128xf32>
    %69 = vector.extract_strided_slice %2 {offsets = [5, 0], sizes = [1, 128], strides = [1, 1]} : vector<27x128xf32> to vector<1x128xf32>
    %c36 = arith.constant 36 : index
    %c0_42 = arith.constant 0 : index
    %70 = vector.load %arg12[%c36, %c0_42] : memref<80x128xf32, #tpu.memory_space<vmem>>, vector<16x128xf32>
    %71 = vector.broadcast %69 : vector<1x128xf32> to vector<16x128xf32>
    %72 = arith.mulf %70, %71 : vector<16x128xf32>
    %73 = arith.addf %68, %72 : vector<16x128xf32>
    %74 = vector.extract_strided_slice %4 {offsets = [0, 1], sizes = [16, 1], strides = [1, 1]} : vector<16x9xf32> to vector<16x1xf32>
    %75 = vector.broadcast %74 : vector<16x1xf32> to vector<16x128xf32>
    %76 = arith.mulf %73, %75 : vector<16x128xf32>
    %77 = arith.addf %57, %76 : vector<16x128xf32>
    %cst_43 = arith.constant 0.000000e+00 : f32
    %78 = vector.broadcast %cst_43 : f32 to vector<16x128xf32>
    %79 = vector.extract_strided_slice %2 {offsets = [6, 0], sizes = [1, 128], strides = [1, 1]} : vector<27x128xf32> to vector<1x128xf32>
    %c5 = arith.constant 5 : index
    %c0_44 = arith.constant 0 : index
    %80 = vector.load %arg12[%c5, %c0_44] : memref<80x128xf32, #tpu.memory_space<vmem>>, vector<16x128xf32>
    %81 = vector.broadcast %79 : vector<1x128xf32> to vector<16x128xf32>
    %82 = arith.mulf %80, %81 : vector<16x128xf32>
    %83 = arith.addf %78, %82 : vector<16x128xf32>
    %84 = vector.extract_strided_slice %2 {offsets = [7, 0], sizes = [1, 128], strides = [1, 1]} : vector<27x128xf32> to vector<1x128xf32>
    %c21 = arith.constant 21 : index
    %c0_45 = arith.constant 0 : index
    %85 = vector.load %arg12[%c21, %c0_45] : memref<80x128xf32, #tpu.memory_space<vmem>>, vector<16x128xf32>
    %86 = vector.broadcast %84 : vector<1x128xf32> to vector<16x128xf32>
    %87 = arith.mulf %85, %86 : vector<16x128xf32>
    %88 = arith.addf %83, %87 : vector<16x128xf32>
    %89 = vector.extract_strided_slice %2 {offsets = [8, 0], sizes = [1, 128], strides = [1, 1]} : vector<27x128xf32> to vector<1x128xf32>
    %c37 = arith.constant 37 : index
    %c0_46 = arith.constant 0 : index
    %90 = vector.load %arg12[%c37, %c0_46] : memref<80x128xf32, #tpu.memory_space<vmem>>, vector<16x128xf32>
    %91 = vector.broadcast %89 : vector<1x128xf32> to vector<16x128xf32>
    %92 = arith.mulf %90, %91 : vector<16x128xf32>
    %93 = arith.addf %88, %92 : vector<16x128xf32>
    %94 = vector.extract_strided_slice %4 {offsets = [0, 2], sizes = [16, 1], strides = [1, 1]} : vector<16x9xf32> to vector<16x1xf32>
    %95 = vector.broadcast %94 : vector<16x1xf32> to vector<16x128xf32>
    %96 = arith.mulf %93, %95 : vector<16x128xf32>
    %97 = arith.addf %77, %96 : vector<16x128xf32>
    %cst_47 = arith.constant 0.000000e+00 : f32
    %98 = vector.broadcast %cst_47 : f32 to vector<16x128xf32>
    %99 = vector.extract_strided_slice %2 {offsets = [9, 0], sizes = [1, 128], strides = [1, 1]} : vector<27x128xf32> to vector<1x128xf32>
    %c7 = arith.constant 7 : index
    %c0_48 = arith.constant 0 : index
    %100 = vector.load %arg12[%c7, %c0_48] : memref<80x128xf32, #tpu.memory_space<vmem>>, vector<16x128xf32>
    %101 = vector.broadcast %99 : vector<1x128xf32> to vector<16x128xf32>
    %102 = arith.mulf %100, %101 : vector<16x128xf32>
    %103 = arith.addf %98, %102 : vector<16x128xf32>
    %104 = vector.extract_strided_slice %2 {offsets = [10, 0], sizes = [1, 128], strides = [1, 1]} : vector<27x128xf32> to vector<1x128xf32>
    %c23 = arith.constant 23 : index
    %c0_49 = arith.constant 0 : index
    %105 = vector.load %arg12[%c23, %c0_49] : memref<80x128xf32, #tpu.memory_space<vmem>>, vector<16x128xf32>
    %106 = vector.broadcast %104 : vector<1x128xf32> to vector<16x128xf32>
    %107 = arith.mulf %105, %106 : vector<16x128xf32>
    %108 = arith.addf %103, %107 : vector<16x128xf32>
    %109 = vector.extract_strided_slice %2 {offsets = [11, 0], sizes = [1, 128], strides = [1, 1]} : vector<27x128xf32> to vector<1x128xf32>
    %c39 = arith.constant 39 : index
    %c0_50 = arith.constant 0 : index
    %110 = vector.load %arg12[%c39, %c0_50] : memref<80x128xf32, #tpu.memory_space<vmem>>, vector<16x128xf32>
    %111 = vector.broadcast %109 : vector<1x128xf32> to vector<16x128xf32>
    %112 = arith.mulf %110, %111 : vector<16x128xf32>
    %113 = arith.addf %108, %112 : vector<16x128xf32>
    %114 = vector.extract_strided_slice %4 {offsets = [0, 3], sizes = [16, 1], strides = [1, 1]} : vector<16x9xf32> to vector<16x1xf32>
    %115 = vector.broadcast %114 : vector<16x1xf32> to vector<16x128xf32>
    %116 = arith.mulf %113, %115 : vector<16x128xf32>
    %117 = arith.addf %97, %116 : vector<16x128xf32>
    %cst_51 = arith.constant 0.000000e+00 : f32
    %118 = vector.broadcast %cst_51 : f32 to vector<16x128xf32>
    %119 = vector.extract_strided_slice %2 {offsets = [12, 0], sizes = [1, 128], strides = [1, 1]} : vector<27x128xf32> to vector<1x128xf32>
    %c8_52 = arith.constant 8 : index
    %c0_53 = arith.constant 0 : index
    %120 = vector.load %arg12[%c8_52, %c0_53] : memref<80x128xf32, #tpu.memory_space<vmem>>, vector<16x128xf32>
    %121 = vector.broadcast %119 : vector<1x128xf32> to vector<16x128xf32>
    %122 = arith.mulf %120, %121 : vector<16x128xf32>
    %123 = arith.addf %118, %122 : vector<16x128xf32>
    %124 = vector.extract_strided_slice %2 {offsets = [13, 0], sizes = [1, 128], strides = [1, 1]} : vector<27x128xf32> to vector<1x128xf32>
    %c24_54 = arith.constant 24 : index
    %c0_55 = arith.constant 0 : index
    %125 = vector.load %arg12[%c24_54, %c0_55] : memref<80x128xf32, #tpu.memory_space<vmem>>, vector<16x128xf32>
    %126 = vector.broadcast %124 : vector<1x128xf32> to vector<16x128xf32>
    %127 = arith.mulf %125, %126 : vector<16x128xf32>
    %128 = arith.addf %123, %127 : vector<16x128xf32>
    %129 = vector.extract_strided_slice %2 {offsets = [14, 0], sizes = [1, 128], strides = [1, 1]} : vector<27x128xf32> to vector<1x128xf32>
    %c40 = arith.constant 40 : index
    %c0_56 = arith.constant 0 : index
    %130 = vector.load %arg12[%c40, %c0_56] : memref<80x128xf32, #tpu.memory_space<vmem>>, vector<16x128xf32>
    %131 = vector.broadcast %129 : vector<1x128xf32> to vector<16x128xf32>
    %132 = arith.mulf %130, %131 : vector<16x128xf32>
    %133 = arith.addf %128, %132 : vector<16x128xf32>
    %134 = arith.addf %117, %133 : vector<16x128xf32>
    %cst_57 = arith.constant 0.000000e+00 : f32
    %135 = vector.broadcast %cst_57 : f32 to vector<16x128xf32>
    %136 = vector.extract_strided_slice %2 {offsets = [15, 0], sizes = [1, 128], strides = [1, 1]} : vector<27x128xf32> to vector<1x128xf32>
    %c9 = arith.constant 9 : index
    %c0_58 = arith.constant 0 : index
    %137 = vector.load %arg12[%c9, %c0_58] : memref<80x128xf32, #tpu.memory_space<vmem>>, vector<16x128xf32>
    %138 = vector.broadcast %136 : vector<1x128xf32> to vector<16x128xf32>
    %139 = arith.mulf %137, %138 : vector<16x128xf32>
    %140 = arith.addf %135, %139 : vector<16x128xf32>
    %141 = vector.extract_strided_slice %2 {offsets = [16, 0], sizes = [1, 128], strides = [1, 1]} : vector<27x128xf32> to vector<1x128xf32>
    %c25 = arith.constant 25 : index
    %c0_59 = arith.constant 0 : index
    %142 = vector.load %arg12[%c25, %c0_59] : memref<80x128xf32, #tpu.memory_space<vmem>>, vector<16x128xf32>
    %143 = vector.broadcast %141 : vector<1x128xf32> to vector<16x128xf32>
    %144 = arith.mulf %142, %143 : vector<16x128xf32>
    %145 = arith.addf %140, %144 : vector<16x128xf32>
    %146 = vector.extract_strided_slice %2 {offsets = [17, 0], sizes = [1, 128], strides = [1, 1]} : vector<27x128xf32> to vector<1x128xf32>
    %c41 = arith.constant 41 : index
    %c0_60 = arith.constant 0 : index
    %147 = vector.load %arg12[%c41, %c0_60] : memref<80x128xf32, #tpu.memory_space<vmem>>, vector<16x128xf32>
    %148 = vector.broadcast %146 : vector<1x128xf32> to vector<16x128xf32>
    %149 = arith.mulf %147, %148 : vector<16x128xf32>
    %150 = arith.addf %145, %149 : vector<16x128xf32>
    %151 = vector.extract_strided_slice %4 {offsets = [0, 5], sizes = [16, 1], strides = [1, 1]} : vector<16x9xf32> to vector<16x1xf32>
    %152 = vector.broadcast %151 : vector<16x1xf32> to vector<16x128xf32>
    %153 = arith.mulf %150, %152 : vector<16x128xf32>
    %154 = arith.addf %134, %153 : vector<16x128xf32>
    %cst_61 = arith.constant 0.000000e+00 : f32
    %155 = vector.broadcast %cst_61 : f32 to vector<16x128xf32>
    %156 = vector.extract_strided_slice %2 {offsets = [18, 0], sizes = [1, 128], strides = [1, 1]} : vector<27x128xf32> to vector<1x128xf32>
    %c11 = arith.constant 11 : index
    %c0_62 = arith.constant 0 : index
    %157 = vector.load %arg12[%c11, %c0_62] : memref<80x128xf32, #tpu.memory_space<vmem>>, vector<16x128xf32>
    %158 = vector.broadcast %156 : vector<1x128xf32> to vector<16x128xf32>
    %159 = arith.mulf %157, %158 : vector<16x128xf32>
    %160 = arith.addf %155, %159 : vector<16x128xf32>
    %161 = vector.extract_strided_slice %2 {offsets = [19, 0], sizes = [1, 128], strides = [1, 1]} : vector<27x128xf32> to vector<1x128xf32>
    %c27 = arith.constant 27 : index
    %c0_63 = arith.constant 0 : index
    %162 = vector.load %arg12[%c27, %c0_63] : memref<80x128xf32, #tpu.memory_space<vmem>>, vector<16x128xf32>
    %163 = vector.broadcast %161 : vector<1x128xf32> to vector<16x128xf32>
    %164 = arith.mulf %162, %163 : vector<16x128xf32>
    %165 = arith.addf %160, %164 : vector<16x128xf32>
    %166 = vector.extract_strided_slice %2 {offsets = [20, 0], sizes = [1, 128], strides = [1, 1]} : vector<27x128xf32> to vector<1x128xf32>
    %c43 = arith.constant 43 : index
    %c0_64 = arith.constant 0 : index
    %167 = vector.load %arg12[%c43, %c0_64] : memref<80x128xf32, #tpu.memory_space<vmem>>, vector<16x128xf32>
    %168 = vector.broadcast %166 : vector<1x128xf32> to vector<16x128xf32>
    %169 = arith.mulf %167, %168 : vector<16x128xf32>
    %170 = arith.addf %165, %169 : vector<16x128xf32>
    %171 = vector.extract_strided_slice %4 {offsets = [0, 6], sizes = [16, 1], strides = [1, 1]} : vector<16x9xf32> to vector<16x1xf32>
    %172 = vector.broadcast %171 : vector<16x1xf32> to vector<16x128xf32>
    %173 = arith.mulf %170, %172 : vector<16x128xf32>
    %174 = arith.addf %154, %173 : vector<16x128xf32>
    %cst_65 = arith.constant 0.000000e+00 : f32
    %175 = vector.broadcast %cst_65 : f32 to vector<16x128xf32>
    %176 = vector.extract_strided_slice %2 {offsets = [21, 0], sizes = [1, 128], strides = [1, 1]} : vector<27x128xf32> to vector<1x128xf32>
    %c12 = arith.constant 12 : index
    %c0_66 = arith.constant 0 : index
    %177 = vector.load %arg12[%c12, %c0_66] : memref<80x128xf32, #tpu.memory_space<vmem>>, vector<16x128xf32>
    %178 = vector.broadcast %176 : vector<1x128xf32> to vector<16x128xf32>
    %179 = arith.mulf %177, %178 : vector<16x128xf32>
    %180 = arith.addf %175, %179 : vector<16x128xf32>
    %181 = vector.extract_strided_slice %2 {offsets = [22, 0], sizes = [1, 128], strides = [1, 1]} : vector<27x128xf32> to vector<1x128xf32>
    %c28 = arith.constant 28 : index
    %c0_67 = arith.constant 0 : index
    %182 = vector.load %arg12[%c28, %c0_67] : memref<80x128xf32, #tpu.memory_space<vmem>>, vector<16x128xf32>
    %183 = vector.broadcast %181 : vector<1x128xf32> to vector<16x128xf32>
    %184 = arith.mulf %182, %183 : vector<16x128xf32>
    %185 = arith.addf %180, %184 : vector<16x128xf32>
    %186 = vector.extract_strided_slice %2 {offsets = [23, 0], sizes = [1, 128], strides = [1, 1]} : vector<27x128xf32> to vector<1x128xf32>
    %c44 = arith.constant 44 : index
    %c0_68 = arith.constant 0 : index
    %187 = vector.load %arg12[%c44, %c0_68] : memref<80x128xf32, #tpu.memory_space<vmem>>, vector<16x128xf32>
    %188 = vector.broadcast %186 : vector<1x128xf32> to vector<16x128xf32>
    %189 = arith.mulf %187, %188 : vector<16x128xf32>
    %190 = arith.addf %185, %189 : vector<16x128xf32>
    %191 = vector.extract_strided_slice %4 {offsets = [0, 7], sizes = [16, 1], strides = [1, 1]} : vector<16x9xf32> to vector<16x1xf32>
    %192 = vector.broadcast %191 : vector<16x1xf32> to vector<16x128xf32>
    %193 = arith.mulf %190, %192 : vector<16x128xf32>
    %194 = arith.addf %174, %193 : vector<16x128xf32>
    %cst_69 = arith.constant 0.000000e+00 : f32
    %195 = vector.broadcast %cst_69 : f32 to vector<16x128xf32>
    %196 = vector.extract_strided_slice %2 {offsets = [24, 0], sizes = [1, 128], strides = [1, 1]} : vector<27x128xf32> to vector<1x128xf32>
    %c13 = arith.constant 13 : index
    %c0_70 = arith.constant 0 : index
    %197 = vector.load %arg12[%c13, %c0_70] : memref<80x128xf32, #tpu.memory_space<vmem>>, vector<16x128xf32>
    %198 = vector.broadcast %196 : vector<1x128xf32> to vector<16x128xf32>
    %199 = arith.mulf %197, %198 : vector<16x128xf32>
    %200 = arith.addf %195, %199 : vector<16x128xf32>
    %201 = vector.extract_strided_slice %2 {offsets = [25, 0], sizes = [1, 128], strides = [1, 1]} : vector<27x128xf32> to vector<1x128xf32>
    %c29 = arith.constant 29 : index
    %c0_71 = arith.constant 0 : index
    %202 = vector.load %arg12[%c29, %c0_71] : memref<80x128xf32, #tpu.memory_space<vmem>>, vector<16x128xf32>
    %203 = vector.broadcast %201 : vector<1x128xf32> to vector<16x128xf32>
    %204 = arith.mulf %202, %203 : vector<16x128xf32>
    %205 = arith.addf %200, %204 : vector<16x128xf32>
    %206 = vector.extract_strided_slice %2 {offsets = [26, 0], sizes = [1, 128], strides = [1, 1]} : vector<27x128xf32> to vector<1x128xf32>
    %c45 = arith.constant 45 : index
    %c0_72 = arith.constant 0 : index
    %207 = vector.load %arg12[%c45, %c0_72] : memref<80x128xf32, #tpu.memory_space<vmem>>, vector<16x128xf32>
    %208 = vector.broadcast %206 : vector<1x128xf32> to vector<16x128xf32>
    %209 = arith.mulf %207, %208 : vector<16x128xf32>
    %210 = arith.addf %205, %209 : vector<16x128xf32>
    %211 = vector.extract_strided_slice %4 {offsets = [0, 8], sizes = [16, 1], strides = [1, 1]} : vector<16x9xf32> to vector<16x1xf32>
    %212 = vector.broadcast %211 : vector<16x1xf32> to vector<16x128xf32>
    %213 = arith.mulf %210, %212 : vector<16x128xf32>
    %214 = arith.addf %194, %213 : vector<16x128xf32>
    %215 = vector.broadcast %3 : vector<1x128xf32> to vector<16x128xf32>
    %216 = arith.addf %214, %215 : vector<16x128xf32>
    %217 = arith.truncf %216 : vector<16x128xf32> to vector<16x128xbf16>
    %c0_73 = arith.constant 0 : index
    %c0_74 = arith.constant 0 : index
    %c0_75 = arith.constant 0 : index
    %218 = vector.load %arg10[%c0_73, %c0_74, %c0_75] : memref<1x32x128xbf16, #tpu.memory_space<vmem>>, vector<1x16x128xbf16>
    %219 = vector.shape_cast %218 : vector<1x16x128xbf16> to vector<16x128xbf16>
    %220 = vector.shape_cast %217 : vector<16x128xbf16> to vector<1x16x128xbf16>
    tpu.vector_store %arg10[%c0_73, %c0_74, %c0_75], %220 {strides = array<i32>} : memref<1x32x128xbf16, #tpu.memory_space<vmem>>, vector<1x16x128xbf16>,
    %cst_76 = arith.constant dense<0.000000e+00> : vector<128xf32>
    %221 = vector.multi_reduction <add>, %216, %cst_76 [0] : vector<16x128xf32> to vector<128xf32>
    %222 = vector.shape_cast %221 : vector<128xf32> to vector<1x128xf32>
    %223 = arith.addf %35, %222 : vector<1x128xf32>
    %224 = arith.mulf %216, %216 : vector<16x128xf32>
    %cst_77 = arith.constant dense<0.000000e+00> : vector<128xf32>
    %225 = vector.multi_reduction <add>, %224, %cst_77 [0] : vector<16x128xf32> to vector<128xf32>
    %226 = vector.shape_cast %225 : vector<128xf32> to vector<1x128xf32>
    %227 = arith.addf %36, %226 : vector<1x128xf32>
    %cst_78 = arith.constant 0.000000e+00 : f32
    %228 = vector.broadcast %cst_78 : f32 to vector<16x128xf32>
    %cst_79 = arith.constant 0.000000e+00 : f32
    %229 = vector.broadcast %cst_79 : f32 to vector<16x128xf32>
    %230 = vector.extract_strided_slice %2 {offsets = [0, 0], sizes = [1, 128], strides = [1, 1]} : vector<27x128xf32> to vector<1x128xf32>
    %c19_80 = arith.constant 19 : index
    %c0_81 = arith.constant 0 : index
    %231 = vector.load %arg12[%c19_80, %c0_81] : memref<80x128xf32, #tpu.memory_space<vmem>>, vector<16x128xf32>
    %232 = vector.broadcast %230 : vector<1x128xf32> to vector<16x128xf32>
    %233 = arith.mulf %231, %232 : vector<16x128xf32>
    %234 = arith.addf %229, %233 : vector<16x128xf32>
    %235 = vector.extract_strided_slice %2 {offsets = [1, 0], sizes = [1, 128], strides = [1, 1]} : vector<27x128xf32> to vector<1x128xf32>
    %c35_82 = arith.constant 35 : index
    %c0_83 = arith.constant 0 : index
    %236 = vector.load %arg12[%c35_82, %c0_83] : memref<80x128xf32, #tpu.memory_space<vmem>>, vector<16x128xf32>
    %237 = vector.broadcast %235 : vector<1x128xf32> to vector<16x128xf32>
    %238 = arith.mulf %236, %237 : vector<16x128xf32>
    %239 = arith.addf %234, %238 : vector<16x128xf32>
    %240 = vector.extract_strided_slice %2 {offsets = [2, 0], sizes = [1, 128], strides = [1, 1]} : vector<27x128xf32> to vector<1x128xf32>
    %c51 = arith.constant 51 : index
    %c0_84 = arith.constant 0 : index
    %241 = vector.load %arg12[%c51, %c0_84] : memref<80x128xf32, #tpu.memory_space<vmem>>, vector<16x128xf32>
    %242 = vector.broadcast %240 : vector<1x128xf32> to vector<16x128xf32>
    %243 = arith.mulf %241, %242 : vector<16x128xf32>
    %244 = arith.addf %239, %243 : vector<16x128xf32>
    %245 = vector.extract_strided_slice %4 {offsets = [0, 0], sizes = [16, 1], strides = [1, 1]} : vector<16x9xf32> to vector<16x1xf32>
    %246 = vector.broadcast %245 : vector<16x1xf32> to vector<16x128xf32>
    %247 = arith.mulf %244, %246 : vector<16x128xf32>
    %248 = arith.addf %228, %247 : vector<16x128xf32>
    %cst_85 = arith.constant 0.000000e+00 : f32
    %249 = vector.broadcast %cst_85 : f32 to vector<16x128xf32>
    %250 = vector.extract_strided_slice %2 {offsets = [3, 0], sizes = [1, 128], strides = [1, 1]} : vector<27x128xf32> to vector<1x128xf32>
    %c20_86 = arith.constant 20 : index
    %c0_87 = arith.constant 0 : index
    %251 = vector.load %arg12[%c20_86, %c0_87] : memref<80x128xf32, #tpu.memory_space<vmem>>, vector<16x128xf32>
    %252 = vector.broadcast %250 : vector<1x128xf32> to vector<16x128xf32>
    %253 = arith.mulf %251, %252 : vector<16x128xf32>
    %254 = arith.addf %249, %253 : vector<16x128xf32>
    %255 = vector.extract_strided_slice %2 {offsets = [4, 0], sizes = [1, 128], strides = [1, 1]} : vector<27x128xf32> to vector<1x128xf32>
    %c36_88 = arith.constant 36 : index
    %c0_89 = arith.constant 0 : index
    %256 = vector.load %arg12[%c36_88, %c0_89] : memref<80x128xf32, #tpu.memory_space<vmem>>, vector<16x128xf32>
    %257 = vector.broadcast %255 : vector<1x128xf32> to vector<16x128xf32>
    %258 = arith.mulf %256, %257 : vector<16x128xf32>
    %259 = arith.addf %254, %258 : vector<16x128xf32>
    %260 = vector.extract_strided_slice %2 {offsets = [5, 0], sizes = [1, 128], strides = [1, 1]} : vector<27x128xf32> to vector<1x128xf32>
    %c52 = arith.constant 52 : index
    %c0_90 = arith.constant 0 : index
    %261 = vector.load %arg12[%c52, %c0_90] : memref<80x128xf32, #tpu.memory_space<vmem>>, vector<16x128xf32>
    %262 = vector.broadcast %260 : vector<1x128xf32> to vector<16x128xf32>
    %263 = arith.mulf %261, %262 : vector<16x128xf32>
    %264 = arith.addf %259, %263 : vector<16x128xf32>
    %265 = vector.extract_strided_slice %4 {offsets = [0, 1], sizes = [16, 1], strides = [1, 1]} : vector<16x9xf32> to vector<16x1xf32>
    %266 = vector.broadcast %265 : vector<16x1xf32> to vector<16x128xf32>
    %267 = arith.mulf %264, %266 : vector<16x128xf32>
    %268 = arith.addf %248, %267 : vector<16x128xf32>
    %cst_91 = arith.constant 0.000000e+00 : f32
    %269 = vector.broadcast %cst_91 : f32 to vector<16x128xf32>
    %270 = vector.extract_strided_slice %2 {offsets = [6, 0], sizes = [1, 128], strides = [1, 1]} : vector<27x128xf32> to vector<1x128xf32>
    %c21_92 = arith.constant 21 : index
    %c0_93 = arith.constant 0 : index
    %271 = vector.load %arg12[%c21_92, %c0_93] : memref<80x128xf32, #tpu.memory_space<vmem>>, vector<16x128xf32>
    %272 = vector.broadcast %270 : vector<1x128xf32> to vector<16x128xf32>
    %273 = arith.mulf %271, %272 : vector<16x128xf32>
    %274 = arith.addf %269, %273 : vector<16x128xf32>
    %275 = vector.extract_strided_slice %2 {offsets = [7, 0], sizes = [1, 128], strides = [1, 1]} : vector<27x128xf32> to vector<1x128xf32>
    %c37_94 = arith.constant 37 : index
    %c0_95 = arith.constant 0 : index
    %276 = vector.load %arg12[%c37_94, %c0_95] : memref<80x128xf32, #tpu.memory_space<vmem>>, vector<16x128xf32>
    %277 = vector.broadcast %275 : vector<1x128xf32> to vector<16x128xf32>
    %278 = arith.mulf %276, %277 : vector<16x128xf32>
    %279 = arith.addf %274, %278 : vector<16x128xf32>
    %280 = vector.extract_strided_slice %2 {offsets = [8, 0], sizes = [1, 128], strides = [1, 1]} : vector<27x128xf32> to vector<1x128xf32>
    %c53 = arith.constant 53 : index
    %c0_96 = arith.constant 0 : index
    %281 = vector.load %arg12[%c53, %c0_96] : memref<80x128xf32, #tpu.memory_space<vmem>>, vector<16x128xf32>
    %282 = vector.broadcast %280 : vector<1x128xf32> to vector<16x128xf32>
    %283 = arith.mulf %281, %282 : vector<16x128xf32>
    %284 = arith.addf %279, %283 : vector<16x128xf32>
    %285 = vector.extract_strided_slice %4 {offsets = [0, 2], sizes = [16, 1], strides = [1, 1]} : vector<16x9xf32> to vector<16x1xf32>
    %286 = vector.broadcast %285 : vector<16x1xf32> to vector<16x128xf32>
    %287 = arith.mulf %284, %286 : vector<16x128xf32>
    %288 = arith.addf %268, %287 : vector<16x128xf32>
    %cst_97 = arith.constant 0.000000e+00 : f32
    %289 = vector.broadcast %cst_97 : f32 to vector<16x128xf32>
    %290 = vector.extract_strided_slice %2 {offsets = [9, 0], sizes = [1, 128], strides = [1, 1]} : vector<27x128xf32> to vector<1x128xf32>
    %c23_98 = arith.constant 23 : index
    %c0_99 = arith.constant 0 : index
    %291 = vector.load %arg12[%c23_98, %c0_99] : memref<80x128xf32, #tpu.memory_space<vmem>>, vector<16x128xf32>
    %292 = vector.broadcast %290 : vector<1x128xf32> to vector<16x128xf32>
    %293 = arith.mulf %291, %292 : vector<16x128xf32>
    %294 = arith.addf %289, %293 : vector<16x128xf32>
    %295 = vector.extract_strided_slice %2 {offsets = [10, 0], sizes = [1, 128], strides = [1, 1]} : vector<27x128xf32> to vector<1x128xf32>
    %c39_100 = arith.constant 39 : index
    %c0_101 = arith.constant 0 : index
    %296 = vector.load %arg12[%c39_100, %c0_101] : memref<80x128xf32, #tpu.memory_space<vmem>>, vector<16x128xf32>
    %297 = vector.broadcast %295 : vector<1x128xf32> to vector<16x128xf32>
    %298 = arith.mulf %296, %297 : vector<16x128xf32>
    %299 = arith.addf %294, %298 : vector<16x128xf32>
    %300 = vector.extract_strided_slice %2 {offsets = [11, 0], sizes = [1, 128], strides = [1, 1]} : vector<27x128xf32> to vector<1x128xf32>
    %c55 = arith.constant 55 : index
    %c0_102 = arith.constant 0 : index
    %301 = vector.load %arg12[%c55, %c0_102] : memref<80x128xf32, #tpu.memory_space<vmem>>, vector<16x128xf32>
    %302 = vector.broadcast %300 : vector<1x128xf32> to vector<16x128xf32>
    %303 = arith.mulf %301, %302 : vector<16x128xf32>
    %304 = arith.addf %299, %303 : vector<16x128xf32>
    %305 = vector.extract_strided_slice %4 {offsets = [0, 3], sizes = [16, 1], strides = [1, 1]} : vector<16x9xf32> to vector<16x1xf32>
    %306 = vector.broadcast %305 : vector<16x1xf32> to vector<16x128xf32>
    %307 = arith.mulf %304, %306 : vector<16x128xf32>
    %308 = arith.addf %288, %307 : vector<16x128xf32>
    %cst_103 = arith.constant 0.000000e+00 : f32
    %309 = vector.broadcast %cst_103 : f32 to vector<16x128xf32>
    %310 = vector.extract_strided_slice %2 {offsets = [12, 0], sizes = [1, 128], strides = [1, 1]} : vector<27x128xf32> to vector<1x128xf32>
    %c24_104 = arith.constant 24 : index
    %c0_105 = arith.constant 0 : index
    %311 = vector.load %arg12[%c24_104, %c0_105] : memref<80x128xf32, #tpu.memory_space<vmem>>, vector<16x128xf32>
    %312 = vector.broadcast %310 : vector<1x128xf32> to vector<16x128xf32>
    %313 = arith.mulf %311, %312 : vector<16x128xf32>
    %314 = arith.addf %309, %313 : vector<16x128xf32>
    %315 = vector.extract_strided_slice %2 {offsets = [13, 0], sizes = [1, 128], strides = [1, 1]} : vector<27x128xf32> to vector<1x128xf32>
    %c40_106 = arith.constant 40 : index
    %c0_107 = arith.constant 0 : index
    %316 = vector.load %arg12[%c40_106, %c0_107] : memref<80x128xf32, #tpu.memory_space<vmem>>, vector<16x128xf32>
    %317 = vector.broadcast %315 : vector<1x128xf32> to vector<16x128xf32>
    %318 = arith.mulf %316, %317 : vector<16x128xf32>
    %319 = arith.addf %314, %318 : vector<16x128xf32>
    %320 = vector.extract_strided_slice %2 {offsets = [14, 0], sizes = [1, 128], strides = [1, 1]} : vector<27x128xf32> to vector<1x128xf32>
    %c56_108 = arith.constant 56 : index
    %c0_109 = arith.constant 0 : index
    %321 = vector.load %arg12[%c56_108, %c0_109] : memref<80x128xf32, #tpu.memory_space<vmem>>, vector<16x128xf32>
    %322 = vector.broadcast %320 : vector<1x128xf32> to vector<16x128xf32>
    %323 = arith.mulf %321, %322 : vector<16x128xf32>
    %324 = arith.addf %319, %323 : vector<16x128xf32>
    %325 = arith.addf %308, %324 : vector<16x128xf32>
    %cst_110 = arith.constant 0.000000e+00 : f32
    %326 = vector.broadcast %cst_110 : f32 to vector<16x128xf32>
    %327 = vector.extract_strided_slice %2 {offsets = [15, 0], sizes = [1, 128], strides = [1, 1]} : vector<27x128xf32> to vector<1x128xf32>
    %c25_111 = arith.constant 25 : index
    %c0_112 = arith.constant 0 : index
    %328 = vector.load %arg12[%c25_111, %c0_112] : memref<80x128xf32, #tpu.memory_space<vmem>>, vector<16x128xf32>
    %329 = vector.broadcast %327 : vector<1x128xf32> to vector<16x128xf32>
    %330 = arith.mulf %328, %329 : vector<16x128xf32>
    %331 = arith.addf %326, %330 : vector<16x128xf32>
    %332 = vector.extract_strided_slice %2 {offsets = [16, 0], sizes = [1, 128], strides = [1, 1]} : vector<27x128xf32> to vector<1x128xf32>
    %c41_113 = arith.constant 41 : index
    %c0_114 = arith.constant 0 : index
    %333 = vector.load %arg12[%c41_113, %c0_114] : memref<80x128xf32, #tpu.memory_space<vmem>>, vector<16x128xf32>
    %334 = vector.broadcast %332 : vector<1x128xf32> to vector<16x128xf32>
    %335 = arith.mulf %333, %334 : vector<16x128xf32>
    %336 = arith.addf %331, %335 : vector<16x128xf32>
    %337 = vector.extract_strided_slice %2 {offsets = [17, 0], sizes = [1, 128], strides = [1, 1]} : vector<27x128xf32> to vector<1x128xf32>
    %c57 = arith.constant 57 : index
    %c0_115 = arith.constant 0 : index
    %338 = vector.load %arg12[%c57, %c0_115] : memref<80x128xf32, #tpu.memory_space<vmem>>, vector<16x128xf32>
    %339 = vector.broadcast %337 : vector<1x128xf32> to vector<16x128xf32>
    %340 = arith.mulf %338, %339 : vector<16x128xf32>
    %341 = arith.addf %336, %340 : vector<16x128xf32>
    %342 = vector.extract_strided_slice %4 {offsets = [0, 5], sizes = [16, 1], strides = [1, 1]} : vector<16x9xf32> to vector<16x1xf32>
    %343 = vector.broadcast %342 : vector<16x1xf32> to vector<16x128xf32>
    %344 = arith.mulf %341, %343 : vector<16x128xf32>
    %345 = arith.addf %325, %344 : vector<16x128xf32>
    %cst_116 = arith.constant 0.000000e+00 : f32
    %346 = vector.broadcast %cst_116 : f32 to vector<16x128xf32>
    %347 = vector.extract_strided_slice %2 {offsets = [18, 0], sizes = [1, 128], strides = [1, 1]} : vector<27x128xf32> to vector<1x128xf32>
    %c27_117 = arith.constant 27 : index
    %c0_118 = arith.constant 0 : index
    %348 = vector.load %arg12[%c27_117, %c0_118] : memref<80x128xf32, #tpu.memory_space<vmem>>, vector<16x128xf32>
    %349 = vector.broadcast %347 : vector<1x128xf32> to vector<16x128xf32>
    %350 = arith.mulf %348, %349 : vector<16x128xf32>
    %351 = arith.addf %346, %350 : vector<16x128xf32>
    %352 = vector.extract_strided_slice %2 {offsets = [19, 0], sizes = [1, 128], strides = [1, 1]} : vector<27x128xf32> to vector<1x128xf32>
    %c43_119 = arith.constant 43 : index
    %c0_120 = arith.constant 0 : index
    %353 = vector.load %arg12[%c43_119, %c0_120] : memref<80x128xf32, #tpu.memory_space<vmem>>, vector<16x128xf32>
    %354 = vector.broadcast %352 : vector<1x128xf32> to vector<16x128xf32>
    %355 = arith.mulf %353, %354 : vector<16x128xf32>
    %356 = arith.addf %351, %355 : vector<16x128xf32>
    %357 = vector.extract_strided_slice %2 {offsets = [20, 0], sizes = [1, 128], strides = [1, 1]} : vector<27x128xf32> to vector<1x128xf32>
    %c59 = arith.constant 59 : index
    %c0_121 = arith.constant 0 : index
    %358 = vector.load %arg12[%c59, %c0_121] : memref<80x128xf32, #tpu.memory_space<vmem>>, vector<16x128xf32>
    %359 = vector.broadcast %357 : vector<1x128xf32> to vector<16x128xf32>
    %360 = arith.mulf %358, %359 : vector<16x128xf32>
    %361 = arith.addf %356, %360 : vector<16x128xf32>
    %362 = vector.extract_strided_slice %4 {offsets = [0, 6], sizes = [16, 1], strides = [1, 1]} : vector<16x9xf32> to vector<16x1xf32>
    %363 = vector.broadcast %362 : vector<16x1xf32> to vector<16x128xf32>
    %364 = arith.mulf %361, %363 : vector<16x128xf32>
    %365 = arith.addf %345, %364 : vector<16x128xf32>
    %cst_122 = arith.constant 0.000000e+00 : f32
    %366 = vector.broadcast %cst_122 : f32 to vector<16x128xf32>
    %367 = vector.extract_strided_slice %2 {offsets = [21, 0], sizes = [1, 128], strides = [1, 1]} : vector<27x128xf32> to vector<1x128xf32>
    %c28_123 = arith.constant 28 : index
    %c0_124 = arith.constant 0 : index
    %368 = vector.load %arg12[%c28_123, %c0_124] : memref<80x128xf32, #tpu.memory_space<vmem>>, vector<16x128xf32>
    %369 = vector.broadcast %367 : vector<1x128xf32> to vector<16x128xf32>
    %370 = arith.mulf %368, %369 : vector<16x128xf32>
    %371 = arith.addf %366, %370 : vector<16x128xf32>
    %372 = vector.extract_strided_slice %2 {offsets = [22, 0], sizes = [1, 128], strides = [1, 1]} : vector<27x128xf32> to vector<1x128xf32>
    %c44_125 = arith.constant 44 : index
    %c0_126 = arith.constant 0 : index
    %373 = vector.load %arg12[%c44_125, %c0_126] : memref<80x128xf32, #tpu.memory_space<vmem>>, vector<16x128xf32>
    %374 = vector.broadcast %372 : vector<1x128xf32> to vector<16x128xf32>
    %375 = arith.mulf %373, %374 : vector<16x128xf32>
    %376 = arith.addf %371, %375 : vector<16x128xf32>
    %377 = vector.extract_strided_slice %2 {offsets = [23, 0], sizes = [1, 128], strides = [1, 1]} : vector<27x128xf32> to vector<1x128xf32>
    %c60 = arith.constant 60 : index
    %c0_127 = arith.constant 0 : index
    %378 = vector.load %arg12[%c60, %c0_127] : memref<80x128xf32, #tpu.memory_space<vmem>>, vector<16x128xf32>
    %379 = vector.broadcast %377 : vector<1x128xf32> to vector<16x128xf32>
    %380 = arith.mulf %378, %379 : vector<16x128xf32>
    %381 = arith.addf %376, %380 : vector<16x128xf32>
    %382 = vector.extract_strided_slice %4 {offsets = [0, 7], sizes = [16, 1], strides = [1, 1]} : vector<16x9xf32> to vector<16x1xf32>
    %383 = vector.broadcast %382 : vector<16x1xf32> to vector<16x128xf32>
    %384 = arith.mulf %381, %383 : vector<16x128xf32>
    %385 = arith.addf %365, %384 : vector<16x128xf32>
    %cst_128 = arith.constant 0.000000e+00 : f32
    %386 = vector.broadcast %cst_128 : f32 to vector<16x128xf32>
    %387 = vector.extract_strided_slice %2 {offsets = [24, 0], sizes = [1, 128], strides = [1, 1]} : vector<27x128xf32> to vector<1x128xf32>
    %c29_129 = arith.constant 29 : index
    %c0_130 = arith.constant 0 : index
    %388 = vector.load %arg12[%c29_129, %c0_130] : memref<80x128xf32, #tpu.memory_space<vmem>>, vector<16x128xf32>
    %389 = vector.broadcast %387 : vector<1x128xf32> to vector<16x128xf32>
    %390 = arith.mulf %388, %389 : vector<16x128xf32>
    %391 = arith.addf %386, %390 : vector<16x128xf32>
    %392 = vector.extract_strided_slice %2 {offsets = [25, 0], sizes = [1, 128], strides = [1, 1]} : vector<27x128xf32> to vector<1x128xf32>
    %c45_131 = arith.constant 45 : index
    %c0_132 = arith.constant 0 : index
    %393 = vector.load %arg12[%c45_131, %c0_132] : memref<80x128xf32, #tpu.memory_space<vmem>>, vector<16x128xf32>
    %394 = vector.broadcast %392 : vector<1x128xf32> to vector<16x128xf32>
    %395 = arith.mulf %393, %394 : vector<16x128xf32>
    %396 = arith.addf %391, %395 : vector<16x128xf32>
    %397 = vector.extract_strided_slice %2 {offsets = [26, 0], sizes = [1, 128], strides = [1, 1]} : vector<27x128xf32> to vector<1x128xf32>
    %c61 = arith.constant 61 : index
    %c0_133 = arith.constant 0 : index
    %398 = vector.load %arg12[%c61, %c0_133] : memref<80x128xf32, #tpu.memory_space<vmem>>, vector<16x128xf32>
    %399 = vector.broadcast %397 : vector<1x128xf32> to vector<16x128xf32>
    %400 = arith.mulf %398, %399 : vector<16x128xf32>
    %401 = arith.addf %396, %400 : vector<16x128xf32>
    %402 = vector.extract_strided_slice %4 {offsets = [0, 8], sizes = [16, 1], strides = [1, 1]} : vector<16x9xf32> to vector<16x1xf32>
    %403 = vector.broadcast %402 : vector<16x1xf32> to vector<16x128xf32>
    %404 = arith.mulf %401, %403 : vector<16x128xf32>
    %405 = arith.addf %385, %404 : vector<16x128xf32>
    %406 = vector.broadcast %3 : vector<1x128xf32> to vector<16x128xf32>
    %407 = arith.addf %405, %406 : vector<16x128xf32>
    %408 = arith.truncf %407 : vector<16x128xf32> to vector<16x128xbf16>
    %c0_134 = arith.constant 0 : index
    %c16 = arith.constant 16 : index
    %c0_135 = arith.constant 0 : index
    %409 = vector.load %arg10[%c0_134, %c16, %c0_135] : memref<1x32x128xbf16, #tpu.memory_space<vmem>>, vector<1x16x128xbf16>
    %410 = vector.shape_cast %409 : vector<1x16x128xbf16> to vector<16x128xbf16>
    %411 = vector.shape_cast %408 : vector<16x128xbf16> to vector<1x16x128xbf16>
    tpu.vector_store %arg10[%c0_134, %c16, %c0_135], %411 {strides = array<i32>} : memref<1x32x128xbf16, #tpu.memory_space<vmem>>, vector<1x16x128xbf16>,
    %cst_136 = arith.constant dense<0.000000e+00> : vector<128xf32>
    %412 = vector.multi_reduction <add>, %407, %cst_136 [0] : vector<16x128xf32> to vector<128xf32>
    %413 = vector.shape_cast %412 : vector<128xf32> to vector<1x128xf32>
    %414 = arith.addf %223, %413 : vector<1x128xf32>
    %415 = arith.mulf %407, %407 : vector<16x128xf32>
    %cst_137 = arith.constant dense<0.000000e+00> : vector<128xf32>
    %416 = vector.multi_reduction <add>, %415, %cst_137 [0] : vector<16x128xf32> to vector<128xf32>
    %417 = vector.shape_cast %416 : vector<128xf32> to vector<1x128xf32>
    %418 = arith.addf %227, %417 : vector<1x128xf32>
    %c0_138 = arith.constant 0 : index
    %c0_139 = arith.constant 0 : index
    %c0_140 = arith.constant 0 : index
    %419 = vector.load %arg11[%c0_138, %c0_139, %c0_140] : memref<1x8x128xf32, #tpu.memory_space<vmem>>, vector<1x1x128xf32>
    %420 = vector.shape_cast %419 : vector<1x1x128xf32> to vector<1x128xf32>
    %421 = vector.shape_cast %414 : vector<1x128xf32> to vector<1x1x128xf32>
    tpu.vector_store %arg11[%c0_138, %c0_139, %c0_140], %421 {strides = array<i32>} : memref<1x8x128xf32, #tpu.memory_space<vmem>>, vector<1x1x128xf32>,
    %c0_141 = arith.constant 0 : index
    %c1 = arith.constant 1 : index
    %c0_142 = arith.constant 0 : index
    %422 = vector.load %arg11[%c0_141, %c1, %c0_142] : memref<1x8x128xf32, #tpu.memory_space<vmem>>, vector<1x1x128xf32>
    %423 = vector.shape_cast %422 : vector<1x1x128xf32> to vector<1x128xf32>
    %424 = vector.shape_cast %418 : vector<1x128xf32> to vector<1x1x128xf32>
    tpu.vector_store %arg11[%c0_141, %c1, %c0_142], %424 {strides = array<i32>} : memref<1x8x128xf32, #tpu.memory_space<vmem>>, vector<1x1x128xf32>,
    %cst_143 = arith.constant 0.000000e+00 : f32
    %425 = vector.broadcast %cst_143 : f32 to vector<6x128xf32>
    %c0_144 = arith.constant 0 : index
    %c2 = arith.constant 2 : index
    %c0_145 = arith.constant 0 : index
    %426 = vector.load %arg11[%c0_144, %c2, %c0_145] : memref<1x8x128xf32, #tpu.memory_space<vmem>>, vector<1x6x128xf32>
    %427 = vector.shape_cast %426 : vector<1x6x128xf32> to vector<6x128xf32>
    %428 = vector.shape_cast %425 : vector<6x128xf32> to vector<1x6x128xf32>
    tpu.vector_store %arg11[%c0_144, %c2, %c0_145], %428 {strides = array<i32>} : memref<1x8x128xf32, #tpu.memory_space<vmem>>, vector<1x6x128xf32>,
    return
  }
  func.func @transform_0(%arg0: i32, %arg1: i32) -> (i32, i32, i32) {
    %c0_i32 = arith.constant 0 : i32
    %c0_i32_0 = arith.constant 0 : i32
    return %arg0, %arg1, %c0_i32 : i32, i32, i32
  }
  func.func @transform_1(%arg0: i32, %arg1: i32) -> (i32, i32, i32) {
    %c2_i32 = arith.constant 2 : i32
    %0 = arith.muli %arg1, %c2_i32 : i32
    %c1_i32 = arith.constant 1 : i32
    %1 = arith.subi %0, %c1_i32 : i32
    %c0_i32 = arith.constant 0 : i32
    %2 = arith.maxsi %1, %c0_i32 : i32
    %c0_i32_0 = arith.constant 0 : i32
    %c0_i32_1 = arith.constant 0 : i32
    return %arg0, %2, %c0_i32_0 : i32, i32, i32
  }
  func.func @transform_2(%arg0: i32, %arg1: i32) -> (i32, i32, i32) {
    %c2_i32 = arith.constant 2 : i32
    %0 = arith.muli %arg1, %c2_i32 : i32
    %c2_i32_0 = arith.constant 2 : i32
    %1 = arith.addi %0, %c2_i32_0 : i32
    %c3_i32 = arith.constant 3 : i32
    %2 = arith.minsi %1, %c3_i32 : i32
    %c0_i32 = arith.constant 0 : i32
    %c0_i32_1 = arith.constant 0 : i32
    return %arg0, %2, %c0_i32 : i32, i32, i32
  }
  func.func @transform_3(%arg0: i32, %arg1: i32) -> (i32, i32) {
    %c0_i32 = arith.constant 0 : i32
    %c0_i32_0 = arith.constant 0 : i32
    %c0_i32_1 = arith.constant 0 : i32
    return %c0_i32, %c0_i32_0 : i32, i32
  }
  func.func @transform_4(%arg0: i32, %arg1: i32) -> (i32, i32) {
    %c0_i32 = arith.constant 0 : i32
    %c0_i32_0 = arith.constant 0 : i32
    %c0_i32_1 = arith.constant 0 : i32
    return %c0_i32, %c0_i32_0 : i32, i32
  }
  func.func @transform_5(%arg0: i32, %arg1: i32) -> (i32, i32) {
    %c0_i32 = arith.constant 0 : i32
    %c0_i32_0 = arith.constant 0 : i32
    %c0_i32_1 = arith.constant 0 : i32
    return %c0_i32, %c0_i32_0 : i32, i32
  }
  func.func @transform_6(%arg0: i32, %arg1: i32) -> (i32, i32) {
    %c0_i32 = arith.constant 0 : i32
    %c0_i32_0 = arith.constant 0 : i32
    %c0_i32_1 = arith.constant 0 : i32
    return %c0_i32, %c0_i32_0 : i32, i32
  }
  func.func @transform_7(%arg0: i32, %arg1: i32) -> (i32, i32) {
    %c0_i32 = arith.constant 0 : i32
    %c0_i32_0 = arith.constant 0 : i32
    %c0_i32_1 = arith.constant 0 : i32
    return %c0_i32, %c0_i32_0 : i32, i32
  }
  func.func @transform_8(%arg0: i32, %arg1: i32) -> (i32, i32, i32) {
    %c0_i32 = arith.constant 0 : i32
    %c0_i32_0 = arith.constant 0 : i32
    return %arg0, %arg1, %c0_i32 : i32, i32, i32
  }
  func.func @transform_9(%arg0: i32, %arg1: i32) -> (i32, i32, i32) {
    %c0_i32 = arith.constant 0 : i32
    %c0_i32_0 = arith.constant 0 : i32
    return %arg0, %arg1, %c0_i32 : i32, i32, i32
  }
}

</mosaic_0001>

<bundles_post_ra>
// kernel: mlp_forward.3
= control target key start
LH: loop header
LB: loop body
LE: loop exit
PB: predicated region body
PF: predicated region fallthrough
CT: control target
= control target key end

     0   :  { %s750_s18 = smov 0   ;;  %s752_s19 = smov 0   ;;  %s865_s0 = inlined_call_operand.vmem [shape: bf16[2,64,128], index: 0, kind: input, shape index: {}]   ;;  %s866_s1 = inlined_call_operand.vmem [shape: f32[1,128], index: 1, kind: input, shape index: {}]   ;;  %s867_s2 = inlined_call_operand.vmem [shape: f32[1,128], index: 2, kind: input, shape index: {}]   ;;  %s868_s3 = inlined_call_operand.vmem [shape: f32[128,16], index: 3, kind: input, shape index: {}]   ;;  %s869_s4 = inlined_call_operand.vmem [shape: f32[1,16], index: 4, kind: input, shape index: {}]   ;;  %s870_s5 = inlined_call_operand.vmem [shape: f32[2,64,16], index: 5, kind: output, shape index: {}]  }
   0x1   :  { %s754_s20 = smov 0   ;;  %s756_s21 = smov 0  }
   0x2   :  { %s758_s22 = smov 0  }
   0x3 LB: > { %s24_s23 = sadd.s32 1, %s710_s20  ;;  %s27_s24 = sadd.s32 1, %s714_s21  ;;  %s718_s22 = sphi %s758_s22, %s15_s22   ;;  %s714_s21 = sphi %s756_s21, %s874_s21   ;;  %s710_s20 = sphi %s754_s20, %s873_s20   ;;  %s706_s19 = sphi %s752_s19, %s872_s19   ;;  %s702_s18 = sphi %s750_s18, %s871_s18  }
   0x4   : > { %p25_p0 = scmp.ge.s32.totalorder %s24_s23, 2  ;;  %p521_p1 = scmp.ge.s32.totalorder %s718_s22, 1 }
   0x5   : > { %p208_p2 = scmp.lt.s32.totalorder %s718_s22, 5 }
   0x6   : > { %s876_s23 = smov (%p25_p0, %s24_s23), 0  ;;  %s878_s24 = smov (!%p25_p0, %s27_s24), %s714_s21 }
   0x7   : > { %p209_p3 = pnand %p521_p1, %p208_p2  ;;  %p29_p4 = scmp.ge.s32.totalorder %s878_s24, 2 }
   0x8   : > { %s522_s29 = sshll.u32 (!%p209_p3), %s702_s18, 2  ;;  %p245_p5 = scmp.lt.s32.totalorder (!%p209_p3), %s706_s19, 1 }
   0x9   : > { %s880_s24 = smov (%p29_p4, %s878_s24), 0  ;;  %212 = sbr.rel (%p209_p3) target bundleno = 247 (0xf7), region = 40 }
   0xa   : > { %p247_p6 = scmp.lt.s32.totalorder (!%p209_p3), %s522_s29, 7 }
   0xe   : > { %v329_v0 = vld [vmem:[%s868_s3 + $0x78] sm:$0xff]  ;;  %v328_v1 = vld [vmem:[%s868_s3 + $0x70] sm:$0xff]  ;;  %v327_v2 = vld [vmem:[%s868_s3 + $0x68] sm:$0xff]  ;;  %s882_s19 = smov (!%p245_p5, %s706_s19), 1  ;;  %s884_s29 = smov (!%p247_p6, %s522_s29), 7  ;;  %vm422_vm0 = vcmask 130048  }
   0xf   : > { %562 = vmatprep.subr.mxu0 %v329_v0  ;;  %600 = vmatprep.subr.mxu1 %v329_v0  ;;  %v326_v3 = vld [vmem:[%s868_s3 + $0x60] sm:$0xff]  ;;  %s523_s9 = sshll.u32 %s882_s19, 3  ;;  %v325_v4 = vld [vmem:[%s868_s3 + $0x58] sm:$0xff]  ;;  %v324_v5 = vld [vmem:[%s868_s3 + $0x50] sm:$0xff] }
  0x10   : > { %563 = vmatpush3.msra.mxu0 %v329_v0  ;;  %616 = vmatpush3.msra.mxu1 %v329_v0  ;;  %s795_s10 = sadd.s32 %s523_s9, %s884_s29  ;;  %v528_v7 = vld [vmem:[%s866_s1] ss:$0 sm:$0xff]  ;;  %v323_v13 = vld [vmem:[%s868_s3 + $0x48] sm:$0xff]  ;;  %v321_v23 = vld [vmem:[%s868_s3 + $0x38] sm:$0xff] }
  0x11   : > { %564 = vmatprep.subr.mxu0 %v328_v1  ;;  %601 = vmatprep.subr.mxu1 %v328_v1  ;;  %s524_s13 = sshll.u32 %s795_s10, 2  ;;  %v529_v14 = vld [vmem:[%s867_s2] ss:$0 sm:$0xff]  ;;  %v320_v27 = vld [vmem:[%s868_s3 + $0x30] sm:$0xff]  ;;  %v319_v30 = vld [vmem:[%s868_s3 + $0x28] sm:$0xff]  ;;  %s527_s29 = sshll.u32 %s795_s10, 3 }
  0x12   : > { %565 = vmatpush3.msra.mxu0 %v328_v1  ;;  %617 = vmatpush3.msra.mxu1 %v328_v1  ;;  %s252_s18 = scalar_lea.vmem %s865_s0, %s524_s13  ;;  %v322_v18 = vld [vmem:[%s868_s3 + $0x40] sm:$0xff]  ;;  %v317_v32 = vld [vmem:[%s868_s3 + $0x18] sm:$0xff]  ;;  %v316_v33 = vld [vmem:[%s868_s3 + $0x10] sm:$0xff]  ;;  %s262_s9 = scalar_lea.vmem %s870_s5, %s527_s29 }
  0x13   : > { %566 = vmatprep.subr.mxu0 %v327_v2  ;;  %602 = vmatprep.subr.mxu1 %v327_v2  ;;  %v534_v6 = vld [vmem:[%s252_s18] sm:$0xff]   ;;  %v541_v8 = vld [vmem:[%s252_s18 + $0x8] sm:$0xff]  }
  0x14   : > { %567 = vmatpush3.msra.mxu0 %v327_v2  ;;  %618 = vmatpush3.msra.mxu1 %v327_v2  ;;  %v535_v9 = vunpack.c.l.bf16 %v534_v6  ;;  %v536_v10 = vunpack.c.h.bf16 %v534_v6  ;;  %v539_v11 = vunpack.c.l.bf16 %v541_v8  ;;  %v540_v12 = vunpack.c.h.bf16 %v541_v8  ;;  %v318_v31 = vld [vmem:[%s868_s3 + $0x20] sm:$0xff]  ;;  %v315_v34 = vld [vmem:[%s868_s3 + $0x8] sm:$0xff] }
  0x15   : > { %568 = vmatprep.subr.mxu0 %v326_v3  ;;  %603 = vmatprep.subr.mxu1 %v326_v3  ;;  %v314_v35 = vld [vmem:[%s868_s3] sm:$0xff] }
  0x16   : > { %569 = vmatpush3.msra.mxu0 %v326_v3  ;;  %619 = vmatpush3.msra.mxu1 %v326_v3  ;;  %v279_v15 = vmul.f32 %v535_v9, %v528_v7  ;;  %v281_v16 = vmul.f32 %v539_v11, %v528_v7  ;;  %v280_v17 = vmul.f32 %v536_v10, %v528_v7  ;;  %v530_v52 = vld [vmem:[%s869_s4] ss:$0 sm:$0xff] }
  0x17   : > { %570 = vmatprep.subr.mxu0 %v325_v4  ;;  %604 = vmatprep.subr.mxu1 %v325_v4  ;;  %v282_v19 = vmul.f32 %v540_v12, %v528_v7 }
  0x18   : > { %571 = vmatpush3.msra.mxu0 %v325_v4  ;;  %620 = vmatpush3.msra.mxu1 %v325_v4  ;;  %v290_v20 = vadd.f32 %v529_v14, %v279_v15  ;;  %v292_v21 = vadd.f32 %v529_v14, %v281_v16  ;;  %v291_v22 = vadd.f32 %v529_v14, %v280_v17 }
  0x19   : > { %572 = vmatprep.subr.mxu0 %v324_v5  ;;  %605 = vmatprep.subr.mxu1 %v324_v5  ;;  %v293_v24 = vadd.f32 %v529_v14, %v282_v19 }
  0x1a   : > { %573 = vmatpush3.msra.mxu0 %v324_v5  ;;  %621 = vmatpush3.msra.mxu1 %v324_v5  ;;  %v298_v25 = vmul.f32 0.70710677, %v290_v20  ;;  %v300_v26 = vmul.f32 0.70710677, %v292_v21  ;;  %v299_v28 = vmul.f32 0.70710677, %v291_v22 }
  0x1b   : > { %574 = vmatprep.subr.mxu0 %v323_v13  ;;  %606 = vmatprep.subr.mxu1 %v323_v13  ;;  %v301_v29 = vmul.f32 0.70710677, %v293_v24  ;;  %v294_v36 = vmul.f32 0.5, %v290_v20  ;;  %v296_v38 = vmul.f32 0.5, %v292_v21  ;;  %v295_v41 = vmul.f32 0.5, %v291_v22 }
  0x1c   : > { %575 = vmatpush3.msra.mxu0 %v323_v13  ;;  %622 = vmatpush3.msra.mxu1 %v323_v13  ;;  %672 = verf.f32 %v298_v25  ;;  %v297_v44 = vmul.f32 0.5, %v293_v24 }
  0x1d   : > { %576 = vmatprep.subr.mxu0 %v322_v18  ;;  %607 = vmatprep.subr.mxu1 %v322_v18  ;;  %674 = verf.f32 %v300_v26 }
  0x1e   : > { %577 = vmatpush3.msra.mxu0 %v322_v18  ;;  %623 = vmatpush3.msra.mxu1 %v322_v18  ;;  %676 = verf.f32 %v299_v28 }
  0x1f   : > { %578 = vmatprep.subr.mxu0 %v321_v23  ;;  %608 = vmatprep.subr.mxu1 %v321_v23  ;;  %678 = verf.f32 %v301_v29 }
  0x20   : > { %579 = vmatpush3.msra.mxu0 %v321_v23  ;;  %624 = vmatpush3.msra.mxu1 %v321_v23 }
  0x21   : > { %580 = vmatprep.subr.mxu0 %v320_v27  ;;  %609 = vmatprep.subr.mxu1 %v320_v27 }
  0x22   : > { %581 = vmatpush3.msra.mxu0 %v320_v27  ;;  %625 = vmatpush3.msra.mxu1 %v320_v27 }
  0x23   : > { %582 = vmatprep.subr.mxu0 %v319_v30  ;;  %610 = vmatprep.subr.mxu1 %v319_v30 }
  0x24   : > { %583 = vmatpush3.msra.mxu0 %v319_v30  ;;  %626 = vmatpush3.msra.mxu1 %v319_v30 }
  0x25   : > { %584 = vmatprep.subr.mxu0 %v318_v31  ;;  %611 = vmatprep.subr.mxu1 %v318_v31 }
  0x26   : > { %585 = vmatpush3.msra.mxu0 %v318_v31  ;;  %627 = vmatpush3.msra.mxu1 %v318_v31 }
  0x27   : > { %586 = vmatprep.subr.mxu0 %v317_v32  ;;  %612 = vmatprep.subr.mxu1 %v317_v32 }
  0x28   : > { %587 = vmatpush3.msra.mxu0 %v317_v32  ;;  %628 = vmatpush3.msra.mxu1 %v317_v32 }
  0x29   : > { %588 = vmatprep.subr.mxu0 %v316_v33  ;;  %613 = vmatprep.subr.mxu1 %v316_v33  ;;  %v673_v37 = vpop.eup %672 }
  0x2a   : > { %589 = vmatpush3.msra.mxu0 %v316_v33  ;;  %629 = vmatpush3.msra.mxu1 %v316_v33  ;;  %v675_v39 = vpop.eup %674  ;;  %v306_v40 = vadd.f32 1.0, %v673_v37 }
  0x2b   : > { %590 = vmatprep.subr.mxu0 %v315_v34  ;;  %614 = vmatprep.subr.mxu1 %v315_v34  ;;  %v677_v42 = vpop.eup %676  ;;  %v308_v43 = vadd.f32 1.0, %v675_v39 }
  0x2c   : > { %591 = vmatpush3.msra.mxu0 %v315_v34  ;;  %630 = vmatpush3.msra.mxu1 %v315_v34  ;;  %v679_v45 = vpop.eup %678  ;;  %v310_v46 = vmul.f32 %v306_v40, %v294_v36  ;;  %v307_v47 = vadd.f32 1.0, %v677_v42 }
  0x2d   : > { %592 = vmatprep.subr.mxu0 %v314_v35  ;;  %615 = vmatprep.subr.mxu1 %v314_v35  ;;  %v312_v48 = vmul.f32 %v308_v43, %v296_v38  ;;  %v309_v49 = vadd.f32 1.0, %v679_v45 }
  0x2e   : > { %593 = vmatpush3.msra.mxu0 %v314_v35  ;;  %631 = vmatpush3.msra.mxu1 %v314_v35  ;;  %v311_v50 = vmul.f32 %v307_v47, %v295_v41 }
  0x2f   : > { %594 = vmatprep.mubr.f32.mxu0 %v310_v46  ;;  %597 = vmatprep.mubr.f32.mxu1 %v312_v48  ;;  %v313_v51 = vmul.f32 %v309_v49, %v297_v44 }
  0x30   : > { %595 = vmatmul.mubr.f32.vlgmr.msra.gmra.mxu0 %v311_v50 }
  0x31   : > { %598 = vmatmul.mubr.f32.vlgmr.msra.gmra.mxu1 %v313_v51 }
  0xf0   : > { %v596_v53 = vpop.f32.mrf.mxu0 }
  0xf1   : > { %v409_v54 = vadd.f32 %v596_v53, %v530_v52  ;;  %v599_v55 = vpop.f32.mrf.mxu1 }
  0xf2   : > { %v419_v56 = vadd.f32 %v599_v55, %v530_v52  ;;  %v403_v57 = vpop.f32.mrf.mxu0 }
  0xf3   : > { %424 = vst.msk [vmem:[%s262_s9 + $0x8] sm:$0xff] %vm422_vm0, %v409_v54  ;;  %v404_v58 = vadd.f32 %v530_v52, %v403_v57  ;;  %v413_v59 = vpop.f32.mrf.mxu1 }
  0xf4   : > { %426 = vst.msk [vmem:[%s262_s9 + $0x18] sm:$0xff] %vm422_vm0, %v419_v56  ;;  %v414_v60 = vadd.f32 %v530_v52, %v413_v59 }
  0xf5   : > { %423 = vst.msk [vmem:[%s262_s9] sm:$0xff] %vm422_vm0, %v404_v58 }
  0xf6   : > { %425 = vst.msk [vmem:[%s262_s9 + $0x10] sm:$0xff] %vm422_vm0, %v414_v60 }
  0xf7 PF: > { %s15_s22 = sadd.s32 1, %s718_s22   ;;  %s871_s18 = smov %s710_s20 }
  0xf8   : > { %p12_p7 = scmp.ge.s32.totalorder %s15_s22, 6   ;;  %s872_s19 = smov %s714_s21 }
  0xf9   : > { %s873_s20 = smov %s876_s23  ;;  %s874_s21 = smov %s880_s24 }
  0xfa   :  { %14 = sbr.rel (!%p12_p7) target bundleno = 3 (0x3), region = 70 }

// kernel: mlp_forward.2
= control target key start
LH: loop header
LB: loop body
LE: loop exit
PB: predicated region body
PF: predicated region fallthrough
CT: control target
= control target key end

     0   :  { %s1876_s30 = smov 0   ;;  %s1878_s10 = smov 0   ;;  %s2455_s0 = inlined_call_operand.vmem [shape: f32[2,64,16], index: 0, kind: input, shape index: {}, may-alias: {0,1,2}]   ;;  %s2456_s1 = inlined_call_operand.vmem [shape: f32[2,64,16], index: 1, kind: input, shape index: {}, may-alias: {0,1,2}]   ;;  %s2457_s2 = inlined_call_operand.vmem [shape: f32[2,64,16], index: 2, kind: input, shape index: {}, may-alias: {0,1,2}]   ;;  %s2458_s3 = inlined_call_operand.vmem [shape: f32[16,128], index: 3, kind: input, shape index: {}]   ;;  %s2459_s4 = inlined_call_operand.vmem [shape: f32[1,128], index: 4, kind: input, shape index: {}]   ;;  %s2460_s5 = inlined_call_operand.vmem [shape: f32[27,128], index: 5, kind: input, shape index: {}]   ;;  %s2461_s6 = inlined_call_operand.vmem [shape: f32[1,128], index: 6, kind: input, shape index: {}]   ;;  %s2462_s7 = inlined_call_operand.vmem [shape: f32[16,9], index: 7, kind: input, shape index: {}]   ;;  %s2463_s8 = inlined_call_operand.vmem [shape: bf16[2,64,128], index: 8, kind: output, shape index: {0}]   ;;  %s2464_s9 = inlined_call_operand.vmem [shape: f32[2,16,128], index: 9, kind: output, shape index: {1}]  }
   0x1   :  { %s1880_s11 = smov 0   ;;  %s1882_s12 = smov 0  }
   0x2   :  { %s1884_s13 = smov 0  }
   0x3 LB: > { %s29_s14 = sadd.s32 1, %s1807_s11  ;;  %s32_s15 = sadd.s32 1, %s1811_s12  ;;  %s1815_s13 = sphi %s1884_s13, %s20_s13   ;;  %s1811_s12 = sphi %s1882_s12, %s2570_s12   ;;  %s1807_s11 = sphi %s1880_s11, %s2569_s11   ;;  %s1803_s10 = sphi %s1878_s10, %s2568_s10   ;;  %s1799_s30 = sphi %s1876_s30, %s2567_s30  }
   0x4   : > { %p30_p0 = scmp.ge.s32.totalorder %s29_s14, 2  ;;  %p1628_p1 = scmp.ge.s32.totalorder %s1815_s13, 1 }
   0x5   : > { %p379_p2 = scmp.lt.s32.totalorder %s1815_s13, 5 }
   0x6   : > { %s2572_s14 = smov (%p30_p0, %s29_s14), 0  ;;  %s2574_s15 = smov (!%p30_p0, %s32_s15), %s1811_s12 }
   0x7   : > { %p380_p3 = pnand %p1628_p1, %p379_p2  ;;  %p34_p4 = scmp.ge.s32.totalorder %s2574_s15, 2 }
   0x9   : > { %s2576_s15 = smov (%p34_p4, %s2574_s15), 0  ;;  %383 = sbr.rel (%p380_p3) target bundleno = 319 (0x13f), region = 52 }
   0xe   : > { %v1911_v0 = vld [vmem:[%s2458_s3 + $0x8] sm:$0xff]  ;;  %v1916_v1 = vld [vmem:[%s2458_s3] sm:$0xff]  ;;  %s1629_s20 = sshll.u32 %s1799_s30, 2  ;;  %p458_p5 = scmp.lt.s32.totalorder %s1803_s10, 1  ;;  %v1817_v2 = vmov 0.0   ;;  %v1818_v4 = vmov 1   ;;  %v827_v21 = vlaneseq }
   0xf   : > { %1705 = vmatprep.subr.mxu0 %v1911_v0  ;;  %p460_p6 = scmp.lt.s32.totalorder %s1629_s20, 7  ;;  %531 = vst [vmem:[#allocation2] sm:$0xff] %v1817_v2  ;;  %532 = vst [vmem:[#allocation2 + $0x48] sm:$0xff] %v1817_v2  ;;  %1691 = vmatprep.subr.mxu1 %v1911_v0  ;;  %v1930_v3 = vld [vmem:[%s2462_s7] sm:$0xff]  ;;  %p515_p7 = scmp.lt.s32.totalorder %s1799_s30, 1  ;;  %vm541_vm0 = vcmask 130048  }
  0x10   : > { %1706 = vmatpush3.msra.mxu0 %v1911_v0  ;;  %s2578_s10 = smov (!%p458_p5, %s1803_s10), 1  ;;  %1692 = vmatpush3.msra.mxu1 %v1911_v0  ;;  %s1632_s26 = sshll.u32 %s1799_s30, 1  ;;  %v1819_v5 = vmov 0   ;;  %v1952_v6 = vld [vmem:[%s2462_s7 + $0x8] sm:$0xff]  ;;  %v1820_v11 = vmov 2   ;;  %v1821_v12 = vmov 3  }
  0x11   : > { %1707 = vmatprep.subr.mxu0 %v1916_v1  ;;  %s2580_s20 = smov (!%p460_p6, %s1629_s20), 7  ;;  %1693 = vmatprep.subr.mxu1 %v1916_v1  ;;  %s1934_s23 = sshll.u32 %s2578_s10, 3  ;;  %v1822_v16 = vmov 5   ;;  %v1823_v18 = vmov 6   ;;  %v1824_v19 = vmov 7   ;;  %v1825_v20 = vmov 8  }
  0x12   : > { %1708 = vmatpush3.msra.mxu0 %v1916_v1  ;;  %1694 = vmatpush3.msra.mxu1 %v1916_v1  ;;  %s1939_s24 = sadd.s32 %s1934_s23, %s2580_s20  ;;  %s1644_s16 = sshll.u32 %s2578_s10, 1  ;;  %v2001_v22 = vld [vmem:[%s2459_s4] ss:$0 sm:$0xff]  ;;  %v828_v23 = vshrl.u32 %v827_v21, 7  ;;  %v525_v36 = vld [vmem:[%s2460_s5 + $0x8] sm:$0xff]  ;;  %v526_v39 = vld [vmem:[%s2460_s5 + $0x10] sm:$0xff] }
  0x13   : > { %1698 = vmatprep.subr.mxu1 %v1911_v0  ;;  %1765 = vset.pattern.permute.xlu1 %v1818_v4  ;;  %s1631_s25 = sshll.u32 %s1939_s24, 3  ;;  %s1633_s20 = sadd.s32 4294967295, %s1632_s26  ;;  %v524_v33 = vld [vmem:[%s2460_s5] sm:$0xff]  ;;  %v527_v58 = vld [vmem:[%s2460_s5 + $0x18] sm:$0x7] }
  0x14   : > { %900 = vperm.xlu1 %1765, %v1930_v3   ;;  %1764 = vset.pattern.permute.xlu0 %v1819_v5  ;;  %s465_s29 = scalar_lea.vmem %s2455_s0, %s1631_s25  ;;  %s486_s21 = sadd.s32 2, %s1632_s26  ;;  %v829_v27 = vsub.s32 0, %v828_v23  ;;  %v839_v28 = vsub.s32 1, %v828_v23  ;;  %v849_v30 = vsub.s32 2, %v828_v23  ;;  %v883_v31 = vsub.s32 4, %v828_v23 }
  0x15   : > { %857 = vperm.xlu0 %1764, %v1930_v3   ;;  %s516_s19 = scalar_select %p515_p7, %s1799_s30, 1  ;;  %v720_v7 = vld [vmem:[%s465_s29] sm:$0xff]  ;;  %v721_v8 = vld [vmem:[%s465_s29 + $0x8] sm:$0xff]  ;;  %v722_v9 = vld [vmem:[%s465_s29 + $0x10] sm:$0xff]  ;;  %v893_v32 = vsub.s32 5, %v828_v23  ;;  %v873_v35 = vsub.s32 3, %v828_v23 }
  0x16   : > { %1709 = vmatprep.mubr.msk.f32.mxu0 %vm541_vm0, %v720_v7  ;;  %p469_p8 = scmp.gt.s32.totalorder %s1633_s20, 0  ;;  %v723_v10 = vld [vmem:[%s465_s29 + $0x18] sm:$0xff]  ;;  %p487_p9 = scmp.lt.s32.totalorder %s486_s21, 3  ;;  %v925_v40 = vsub.s32 7, %v828_v23  ;;  %v2022_v43 = vrot.slane %v524_v33, %v829_v27  ;;  %v2024_v44 = vrot.slane %v524_v33, %v839_v28  ;;  %v915_v45 = vsub.s32 6, %v828_v23 }
  0x17   : > { %s518_s22 = sadd.s32 %s1644_s16, %s516_s19  ;;  %1710 = vmatmul.mubr.msk.f32.vlgmr.msra.gmra.mxu0 %vm541_vm0, %v721_v8  ;;  %p706_p12 = scmp.eq.s32.totalorder %s1799_s30, 0  ;;  %v2027_v47 = vrot.slane %v524_v33, %v849_v30  ;;  %v2029_v48 = vrot.slane %v525_v36, %v883_v31  ;;  %v1010_v49 = vrot.slane %v525_v36, %v893_v32  ;;  %v2031_v50 = vrot.slane %v524_v33, %v873_v35 }
  0x18   : > { %904 = vperm.xlu1 %1765, %v1952_v6   ;;  %s1645_s10 = sshll.u32 %s518_s22, 3  ;;  %1712 = vmatprep.mubr.msk.f32.mxu0 %vm541_vm0, %v722_v9  ;;  %s2582_s20 = smov (!%p469_p8, %s1633_s20), 0  ;;  %v2033_v51 = vrot.slane %v524_v33, %v883_v31  ;;  %v2035_v52 = vrot.slane %v524_v33, %v893_v32  ;;  %v2037_v53 = vrot.slane %v526_v39, %v849_v30 }
  0x19   : > { %862 = vperm.xlu0 %1764, %v1952_v6   ;;  %s1966_s28 = scalar_lea.vmem %s2464_s9, %s1645_s10  ;;  %s2584_s21 = smov (!%p487_p9, %s486_s21), 3  ;;  %v2039_v54 = vrot.slane %v526_v39, %v873_v35  ;;  %v2041_v55 = vrot.slane %v524_v33, %v915_v45  ;;  %v2043_v56 = vrot.slane %v524_v33, %v925_v40  ;;  %v2045_v57 = vrot.slane %v525_v36, %v829_v27 }
  0x1a   : > { %1444 = vst [vmem:[%s1966_s28 + $0x2] sm:$0x3f] %v1817_v2  ;;  %s1634_s26 = sshll.u32 %s2582_s20, 1  ;;  %s1638_s29 = sshll.u32 %s2584_s21, 1  ;;  %v2050_v59 = vrot.slane %v525_v36, %v839_v28  ;;  %v2052_v60 = vrot.slane %v525_v36, %v849_v30  ;;  %v2054_v61 = vrot.slane %v525_v36, %v873_v35  ;;  %v2056_v62 = vrot.slane %v525_v36, %v915_v45 }
  0x1b   : > { %1713 = vmatmul.mubr.msk.f32.gmra.mxu0 %vm541_vm0, %v723_v10  ;;  %p474_p10 = scmp.lt.s32.totalorder %s1634_s26, 7  ;;  %p492_p11 = scmp.lt.s32.totalorder %s1638_s29, 7  ;;  %v2062_v4 = vrot.slane %v526_v39, %v893_v32  ;;  %v2064_v5 = vrot.slane %v526_v39, %v915_v45  ;;  %v2072_v10 = vrot.slane %v526_v39, %v925_v40 }
  0x1c   : > { %1767 = vset.pattern.permute.xlu1 %v1820_v11  ;;  %p711_p13 = scmp.eq.s32.totalorder %s1799_s30, 1 }
  0x1d   : > { %946 = vperm.xlu1 %1767, %v1952_v6   ;;  %1766 = vset.pattern.permute.xlu0 %v1820_v11  ;;  %s2586_s26 = smov (!%p474_p10, %s1634_s26), 7  ;;  %s2588_s29 = smov (!%p492_p11, %s1638_s29), 7  ;;  %2493 = vst [vmem:[#allocation3_spill] sm:$0xff] %v2062_v4  ;;  %2494 = vst [vmem:[#allocation4_spill] sm:$0xff] %v2064_v5  ;;  %v2074_v11 = vrot.slane %v527_v58, %v839_v28 }
  0x1e   : > { %942 = vperm.xlu0 %1766, %v1930_v3   ;;  %s477_s16 = sadd.s32 %s1934_s23, %s2586_s26  ;;  %s495_s18 = sadd.s32 %s1934_s23, %s2588_s29 }
  0x1f   : > { %s1636_s17 = sshll.u32 %s477_s16, 3  ;;  %s1640_s21 = sshll.u32 %s495_s18, 3  ;;  %2497 = vst [vmem:[#allocation7_spill] sm:$0xff] %v2074_v11 }
  0x20   : > { %s479_s22 = scalar_lea.vmem %s2456_s1, %s1636_s17  ;;  %s497_s27 = scalar_lea.vmem %s2457_s2, %s1640_s21 }
  0x21   : > { %1768 = vset.pattern.permute.xlu1 %v1821_v12  ;;  %v533_v13 = vld [vmem:[%s479_s22] sm:$0xff]  ;;  %v534_v14 = vld [vmem:[%s479_s22 + $0x8] sm:$0xff]  ;;  %s2005_s29 = scalar_select %p706_p12, 0.0, 1.0 }
  0x22   : > { %984 = vperm.xlu1 %1768, %v1930_v3   ;;  %1769 = vset.pattern.permute.xlu0 %v1821_v12  ;;  %v623_v15 = vld [vmem:[%s497_s27] sm:$0xff]  ;;  %v624_v17 = vld [vmem:[%s497_s27 + $0x8] sm:$0xff]  ;;  %s2007_s16 = scalar_select %p711_p13, 0.0, 1.0  ;;  %v2076_v12 = vrot.slane %v527_v58, %v849_v30 }
  0x23   : > { %988 = vperm.xlu0 %1769, %v1952_v6   ;;  %1695 = vmatprep.mubr.msk.f32.mxu1 %vm541_vm0, %v533_v13  ;;  %v708_v38 = vstv %s2005_s29  ;;  %v2078_v13 = vrot.slane %v525_v36, %v925_v40  ;;  %s1643_s23 = sshll.u32 %s1939_s24, 2 }
  0x24   : > { %1696 = vmatmul.mubr.msk.f32.vlgmr.msra.gmra.mxu1 %vm541_vm0, %v534_v14  ;;  %2498 = vst [vmem:[#allocation8_spill] sm:$0xff] %v2076_v12 }
  0x25   : > { %1699 = vmatpush3.msra.mxu1 %v1911_v0  ;;  %1702 = vmatprep.mubr.msk.f32.mxu1 %vm541_vm0, %v623_v15  ;;  %2499 = vst [vmem:[#allocation9_spill] sm:$0xff] %v2078_v13 }
  0x26   : > { %1770 = vset.pattern.permute.xlu1 %v1822_v16  ;;  %1700 = vmatprep.subr.mxu1 %v1916_v1 }
  0x27   : > { %1058 = vperm.xlu1 %1770, %v1930_v3   ;;  %1771 = vset.pattern.permute.xlu0 %v1823_v18 }
  0x28   : > { %1701 = vmatpush3.msra.mxu1 %v1916_v1  ;;  %1100 = vperm.xlu0 %1771, %v1930_v3  }
  0x29   : > { %1703 = vmatmul.mubr.msk.f32.vlgmr.msra.gmra.mxu1 %vm541_vm0, %v624_v17 }
  0x2b   : > { %1062 = vperm.xlu1 %1770, %v1952_v6  }
  0x2c   : > { %1774 = vset.pattern.permute.xlu0 %v1824_v19 }
  0x2d   : > { %1146 = vperm.xlu0 %1774, %v1952_v6  }
  0x2f   : > { %1772 = vset.pattern.permute.xlu1 %v1823_v18  ;;  %v2084_v18 = vrot.slane %v526_v39, %v829_v27 }
  0x30   : > { %1104 = vperm.xlu1 %1772, %v1952_v6  }
  0x31   : > { %1776 = vset.pattern.permute.xlu0 %v1825_v20  ;;  %2501 = vst [vmem:[#allocation11_spill] sm:$0xff] %v2084_v18 }
  0x34   : > { %1773 = vset.pattern.permute.xlu1 %v1824_v19  ;;  %v2086_v19 = vrot.slane %v526_v39, %v839_v28 }
  0x35   : > { %1142 = vperm.xlu1 %1773, %v1930_v3  }
  0x39   : > { %1775 = vset.pattern.permute.xlu1 %v1825_v20 }
  0x3a   : > { %1184 = vperm.xlu1 %1775, %v1930_v3   ;;  %v2060_v3 = vrot.slane %v526_v39, %v883_v31 }
  0x3e   : > { %1188 = vperm.xlu1 %1775, %v1952_v6   ;;  %v2066_v6 = vrot.slane %v527_v58, %v829_v27 }
  0x40   : > { %2495 = vst [vmem:[#allocation5_spill] sm:$0xff] %v2066_v6 }
  0x8f   : > { %v2068_v7 = vpop.permute.xlu1 %900 }
  0x93   : > { %v2123_v45 = vpop.permute.xlu1 %904 }
  0x94   : > { %2507 = vst [vmem:[#allocation17_spill] sm:$0xff] %v2123_v45 }
  0xd7   : > { %v1711_v24 = vpop.f32.mrf.mxu0 }
  0xd8   : > { %v808_v25 = vadd.f32 %v1711_v24, %v2001_v22 }
  0xd9   : > { %v802_v26 = vpop.f32.mrf.mxu0 }
  0xda   : > { %822 = vst [vmem:[#allocation2 + $0x20] sm:$0xff] %v808_v25  ;;  %v803_v29 = vadd.f32 %v2001_v22, %v802_v26  ;;  %v1322_v63 = vmul.f32 %v2029_v48, %v808_v25  ;;  %v2080_v16 = vmul.f32 %v1010_v49, %v808_v25 }
  0xdb   : > { %v1714_v34 = vpop.f32.mrf.mxu0 }
  0xdc   : > { %821 = vst [vmem:[#allocation2 + $0x18] sm:$0xff] %v803_v29  ;;  %v818_v37 = vadd.f32 %v1714_v34, %v2001_v22  ;;  %v1321_v1 = vmul.f32 %v2029_v48, %v803_v29  ;;  %v2082_v17 = vmul.f32 %v1010_v49, %v803_v29 }
  0xdd   : > { %v812_v41 = vpop.f32.mrf.mxu0 }
  0xde   : > { %824 = vst [vmem:[#allocation2 + $0x30] sm:$0xff] %v818_v37  ;;  %v813_v46 = vadd.f32 %v2001_v22, %v812_v41  ;;  %v1328_v0 = vmul.f32 %v1010_v49, %v818_v37  ;;  %2500 = vst [vmem:[#allocation10_spill] sm:$0xff] %v2082_v17  ;;  %v2089_v21 = vmul.f32 %v2056_v62, %v818_v37 }
  0xe0   : > { %823 = vst [vmem:[#allocation2 + $0x28] sm:$0xff] %v813_v46  ;;  %v1327_v2 = vmul.f32 %v1010_v49, %v813_v46  ;;  %v2091_v23 = vadd.f32 %v1328_v0, %v1322_v63  ;;  %v2094_v24 = vmul.f32 %v2056_v62, %v813_v46 }
  0xe2   : > { %2502 = vst [vmem:[#allocation12_spill] sm:$0xff] %v2094_v24  ;;  %v2096_v26 = vadd.f32 %v1327_v2, %v1321_v1 }
  0xe3   : > { %v2070_v8 = vld [vmem:[#allocation2 + $0x1b] sm:$0xff] }
  0xe4   : > { %2496 = vst [vmem:[#allocation6_spill] sm:$0xff] %v2070_v8  ;;  %v880_v9 = vld [vmem:[#allocation2 + $0x1c] sm:$0xff]  ;;  %v1697_v20 = vpop.f32.mrf.mxu1  ;;  %2503 = vst [vmem:[#allocation13_spill] sm:$0xff] %v2096_v26  ;;  %v2101_v27 = vmul.f32 %v2024_v44, %v2070_v8  ;;  %v1234_v40 = vmul.f32 %v2070_v8, %v2022_v43 }
  0xe5   : > { %v922_v14 = vld [vmem:[#allocation2 + $0x1d] sm:$0xff]  ;;  %v620_v25 = vadd.f32 %v1697_v20, %v2001_v22  ;;  %v2104_v28 = vmul.f32 %v2033_v51, %v880_v9  ;;  %v2107_v29 = vmul.f32 %v2064_v5, %v880_v9  ;;  %v1256_v32 = vmul.f32 %v880_v9, %v2031_v50 }
  0xe6   : > { %v964_v15 = vld [vmem:[#allocation2 + $0x1f] sm:$0xff]  ;;  %v614_v31 = vpop.f32.mrf.mxu1  ;;  %v1378_v33 = vmul.f32 %v2062_v4, %v880_v9  ;;  %v2112_v34 = vmul.f32 %v2043_v56, %v922_v14  ;;  %v1278_v41 = vmul.f32 %v922_v14, %v2041_v55  ;;  %v2129_v63 = vmul.f32 %v2074_v11, %v922_v14 }
  0xe7   : > { %2504 = vst [vmem:[#allocation14_spill] sm:$0xff] %v2107_v29  ;;  %v1037_v30 = vld [vmem:[#allocation2 + $0x19] sm:$0xff]  ;;  %v2115_v35 = vmul.f32 %v2052_v60, %v964_v15  ;;  %v710_v36 = vmul.f32 %v708_v38, %v620_v25  ;;  %v615_v37 = vadd.f32 %v2001_v22, %v614_v31  ;;  %v1080_v39 = vld [vmem:[#allocation2 + $0x23] sm:$0xff]  ;;  %v2125_v49 = vld [vmem:[#allocation2 + $0x2b] sm:$0xff]  ;;  %v1300_v58 = vmul.f32 %v964_v15, %v2050_v59 }
  0xe8   : > { %2505 = vst [vmem:[#allocation15_spill] sm:$0xff] %v2112_v34  ;;  %2508 = vst [vmem:[#allocation18_spill] sm:$0xff] %v2129_v63  ;;  %v2132_v0 = vmul.f32 %v2066_v6, %v922_v14  ;;  %v2135_v1 = vmul.f32 %v2084_v18, %v1037_v30  ;;  %v890_v20 = vld [vmem:[#allocation2 + $0x2c] sm:$0xff]  ;;  %v2140_v25 = vld [vmem:[#allocation2 + $0x24] sm:$0xff]  ;;  %v2146_v15 = vmul.f32 %v2039_v54, %v2070_v8 }
  0xe9   : > { %2506 = vst [vmem:[#allocation16_spill] sm:$0xff] %v2115_v35  ;;  %v1704_v46 = vpop.f32.mrf.mxu1  ;;  %717 = vst [vmem:[#allocation2 + $0x10] sm:$0xff] %v710_v36  ;;  %v709_v2 = vmul.f32 %v708_v38, %v615_v37  ;;  %v2142_v31 = vld [vmem:[#allocation2 + $0x25] sm:$0xff]  ;;  %v2149_v14 = vmul.f32 %v1037_v30, %v2078_v13  ;;  %v2153_v42 = vmul.f32 %v2027_v47, %v2125_v49  ;;  %v932_v8 = vld [vmem:[#allocation2 + $0x2d] sm:$0xff] }
  0xea   : > { %2509 = vst [vmem:[#allocation19_spill] sm:$0xff] %v2135_v1  ;;  %v703_v9 = vadd.f32 %v1704_v46, %v2001_v22  ;;  %2510 = vst [vmem:[#allocation20_spill] sm:$0xff] %v2140_v25  ;;  %v2156_v38 = vmul.f32 %v2035_v52, %v890_v20  ;;  %v2159_v46 = vmul.f32 %v2039_v54, %v1080_v39  ;;  %v973_v1 = vld [vmem:[#allocation2 + $0x27] sm:$0xff]  ;;  %v974_v24 = vld [vmem:[#allocation2 + $0x2f] sm:$0xff] }
  0xeb   : > { %2511 = vst [vmem:[#allocation21_spill] sm:$0xff] %v2142_v31  ;;  %2512 = vst [vmem:[#allocation22_spill] sm:$0xff] %v2146_v15  ;;  %v697_v37 = vpop.f32.mrf.mxu1  ;;  %v2162_v26 = vmul.f32 %v1080_v39, %v2024_v44  ;;  %v2514_v15 = vstv %s2007_s16  ;;  %v2168_v18 = vmul.f32 %v1080_v39, %v2037_v53  ;;  %v1002_v13 = vmul.f32 %v2029_v48, %v710_v36  ;;  %s511_s16 = scalar_lea.vmem %s2463_s8, %s1643_s23 }
  0xec   : > { %2513 = vst [vmem:[#allocation23_spill] sm:$0xff] %v2149_v14  ;;  %716 = vst [vmem:[#allocation2 + $0x8] sm:$0xff] %v709_v2  ;;  %v715_v30 = vmul.f32 %v2514_v15, %v703_v9  ;;  %v698_v14 = vadd.f32 %v2001_v22, %v697_v37  ;;  %v2172_v17 = vmul.f32 %v1080_v39, %v2027_v47  ;;  %v2516_v9 = vmov %v2514_v15 }
  0xed   : > { %2515 = vst [vmem:[#allocation24_spill] sm:$0xff] %v2168_v18  ;;  %v2176_v63 = vmul.f32 %v2035_v52, %v2140_v25  ;;  %v2180_v6 = vmul.f32 %v2045_v57, %v2142_v31  ;;  %v1262_v22 = vmul.f32 %v890_v20, %v2033_v51  ;;  %v1382_v37 = vmul.f32 %v2064_v5, %v890_v20  ;;  %v2191_v18 = vpop.permute.xlu1 %946 }
  0xee   : > { %719 = vst [vmem:[#allocation2 + $0x40] sm:$0xff] %v715_v30  ;;  %v2185_v15 = vmul.f32 %v2516_v9, %v698_v14  ;;  %v1240_v36 = vmul.f32 %v2125_v49, %v2024_v44  ;;  %v1284_v39 = vmul.f32 %v932_v8, %v2043_v56  ;;  %2517 = vst [vmem:[#allocation25_spill] sm:$0xff] %v2191_v18 }
  0xef   : > { %v2194_v35 = vmul.f32 %v2054_v61, %v973_v1  ;;  %v1014_v29 = vadd.f32 %v2080_v16, %v1002_v13  ;;  %v1306_v34 = vmul.f32 %v974_v24, %v2052_v60  ;;  %v1334_v4 = vmul.f32 %v2056_v62, %v715_v30 }
  0xf0   : > { %718 = vst [vmem:[#allocation2 + $0x38] sm:$0xff] %v2185_v15  ;;  %v2202_v14 = vmul.f32 %v2140_v25, %v2033_v51  ;;  %v2206_v9 = vmul.f32 %v2142_v31, %v2043_v56  ;;  %v2209_v5 = vmul.f32 %v973_v1, %v2052_v60  ;;  %v2212_v18 = vmul.f32 %v2072_v10, %v890_v20  ;;  %v1070_v13 = vld [vmem:[#allocation2 + $0x13] sm:$0xff] }
  0xf1   : > { %2518 = vst [vmem:[#allocation26_spill] sm:$0xff] %v2194_v35  ;;  %v2214_v16 = vadd.f32 %v1262_v22, %v1256_v32  ;;  %v2217_v30 = vmul.f32 %v2045_v57, %v932_v8  ;;  %v2220_v45 = vmul.f32 %v2054_v61, %v974_v24  ;;  %v1399_v25 = vmul.f32 %v2074_v11, %v932_v8  ;;  %v2223_v35 = vld [vmem:[#allocation2 + $0x14] sm:$0xff] }
  0xf2   : > { %2519 = vst [vmem:[#allocation27_spill] sm:$0xff] %v2209_v5  ;;  %2520 = vst [vmem:[#allocation28_spill] sm:$0xff] %v2212_v18  ;;  %v2225_v31 = vld [vmem:[#allocation2 + $0x15] sm:$0xff]  ;;  %v2227_v1 = vadd.f32 %v1382_v37, %v1378_v33  ;;  %v2229_v5 = vadd.f32 %v1240_v36, %v1234_v40  ;;  %v2231_v20 = vadd.f32 %v1284_v39, %v1278_v41  ;;  %v858_v41 = vpop.permute.xlu0 %857  ;;  %v2257_v39 = vpop.permute.xlu1 %984 }
  0xf3   : > { %2521 = vst [vmem:[#allocation29_spill] sm:$0xff] %v2220_v45  ;;  %2522 = vst [vmem:[#allocation30_spill] sm:$0xff] %v2223_v35  ;;  %v2234_v32 = vmul.f32 %v2076_v12, %v932_v8  ;;  %v2236_v22 = vld [vmem:[#allocation2 + $0xb] sm:$0xff]  ;;  %v825_v24 = vld [vmem:[#allocation2 + $0x3] sm:$0xff]  ;;  %v2241_v11 = vadd.f32 %v2089_v21, %v1014_v29  ;;  %v2243_v45 = vadd.f32 %v1306_v34, %v1300_v58 }
  0xf4   : > { %2523 = vst [vmem:[#allocation31_spill] sm:$0xff] %v2227_v1  ;;  %2525 = vst [vmem:[#allocation33_spill] sm:$0xff] %v2236_v22  ;;  %v2238_v18 = vld [vmem:[#allocation2 + $0xc] sm:$0xff]  ;;  %v2246_v33 = vadd.f32 %v1334_v4, %v2091_v23  ;;  %v2249_v40 = vmul.f32 %v2029_v48, %v709_v2  ;;  %v832_v8 = vmul.f32 %v2022_v43, %v2236_v22  ;;  %v869_v29 = vld [vmem:[#allocation2 + $0x4] sm:$0xff] }
  0xf5   : > { %2524 = vst [vmem:[#allocation32_spill] sm:$0xff] %v2234_v32  ;;  %2526 = vst [vmem:[#allocation34_spill] sm:$0xff] %v2241_v11  ;;  %v876_v37 = vmul.f32 %v2031_v50, %v2238_v18  ;;  %v831_v36 = vmul.f32 %v2022_v43, %v825_v24  ;;  %v841_v21 = vmul.f32 %v1070_v13, %v2024_v44  ;;  %v911_v34 = vld [vmem:[#allocation2 + $0x5] sm:$0xff]  ;;  %v963_v2 = vld [vmem:[#allocation2 + $0x17] sm:$0xff] }
  0xf6   : > { %2527 = vst [vmem:[#allocation35_spill] sm:$0xff] %v2246_v33  ;;  %v953_v58 = vld [vmem:[#allocation2 + $0x7] sm:$0xff]  ;;  %v875_v4 = vmul.f32 %v2031_v50, %v869_v29  ;;  %v885_v48 = vmul.f32 %v2033_v51, %v2223_v35  ;;  %v917_v23 = vmul.f32 %v2041_v55, %v911_v34  ;;  %v2264_v33 = vadd.f32 %v1399_v25, %v2132_v0 }
  0xf7   : > { %v844_v24 = vadd.f32 %v2101_v27, %v832_v8  ;;  %v843_v11 = vadd.f32 %v841_v21, %v831_v36  ;;  %v959_v44 = vmul.f32 %v2050_v59, %v953_v58  ;;  %v1233_v32 = vmul.f32 %v1070_v13, %v2022_v43  ;;  %v2269_v22 = vld [vmem:[#allocation2 + $0x29] sm:$0xff]  ;;  %v1090_v12 = vld [vmem:[#allocation2 + $0x33] sm:$0xff]  ;;  %v2289_v58 = vpop.permute.xlu0 %862 }
  0xf8   : > { %v1076_v29 = vmul.f32 %v2037_v53, %v1070_v13  ;;  %v887_v1 = vadd.f32 %v885_v48, %v875_v4  ;;  %v927_v51 = vmul.f32 %v2043_v56, %v2225_v31  ;;  %v2276_v0 = vmul.f32 %v2086_v19, %v2269_v22  ;;  %v1369_v36 = vld [vmem:[#allocation2 + $0x43] sm:$0xff]  ;;  %v2293_v4 = vld [vmem:[#allocation2 + $0x34] sm:$0xff] }
  0xf9   : > { %v888_v27 = vadd.f32 %v2104_v28, %v876_v37  ;;  %v1245_v25 = vmul.f32 %v1090_v12, %v2027_v47  ;;  %v969_v8 = vmul.f32 %v2052_v60, %v963_v2  ;;  %v1255_v43 = vmul.f32 %v2223_v35, %v2031_v50  ;;  %2528 = vst [vmem:[#allocation36_spill] sm:$0xff] %v2293_v4 }
  0xfa   : > { %v853_v13 = vadd.f32 %v2172_v17, %v843_v11  ;;  %v897_v21 = vadd.f32 %v2176_v63, %v887_v1  ;;  %v929_v34 = vadd.f32 %v927_v51, %v917_v23  ;;  %v2287_v56 = vmul.f32 %v2060_v3, %v2125_v49  ;;  %v2299_v11 = vpop.permute.xlu1 %1058  ;;  %v1266_v51 = vld [vmem:[#allocation2 + $0x3c] sm:$0xff] }
  0xfb   : > { %v854_v28 = vadd.f32 %v2153_v42, %v844_v24  ;;  %v971_v37 = vadd.f32 %v969_v8, %v959_v44  ;;  %v1241_v60 = vadd.f32 %v2162_v26, %v1233_v32  ;;  %v2297_v50 = vmul.f32 %v2056_v62, %v2185_v15  ;;  %v2305_v42 = vld [vmem:[#allocation2 + $0x35] sm:$0xff] }
  0xfc   : > { %v1088_v17 = vadd.f32 %v2159_v46, %v1076_v29  ;;  %v865_v63 = vmul.f32 %v858_v41, %v853_v13  ;;  %v907_v1 = vmul.f32 %v2068_v7, %v897_v21  ;;  %v1277_v48 = vmul.f32 %v2225_v31, %v2041_v55  ;;  %2529 = vst [vmem:[#allocation37_spill] sm:$0xff] %v2305_v42  ;;  %v1309_v29 = vld [vmem:[#allocation2 + $0x37] sm:$0xff]  ;;  %v2531_v21 = vld [vmem:[#allocation17_spill] sm:$0xff] }
  0xfd   : > { %v898_v26 = vadd.f32 %v2156_v38, %v888_v27  ;;  %v2309_v32 = vmul.f32 %v1369_v36, %v2060_v3  ;;  %v1247_v23 = vadd.f32 %v1245_v25, %v1241_v60  ;;  %v1263_v62 = vadd.f32 %v2202_v14, %v1255_v43  ;;  %v2530_v38 = vld [vmem:[#allocation26_spill] sm:$0xff]  ;;  %v943_v60 = vpop.permute.xlu0 %942 }
  0xfe   : > { %v1096_v15 = vmul.f32 %v2060_v3, %v1090_v12  ;;  %v1366_v46 = vmul.f32 %v1090_v12, %v2039_v54  ;;  %v939_v24 = vadd.f32 %v2180_v6, %v929_v34  ;;  %v1267_v44 = vmul.f32 %v2293_v4, %v2035_v52  ;;  %v912_v43 = vld [vmem:[#allocation2 + $0xd] sm:$0xff] }
  0xff   : > { %v866_v8 = vmul.f32 %v2289_v58, %v854_v28  ;;  %v981_v27 = vadd.f32 %v2530_v38, %v971_v37  ;;  %v1289_v25 = vmul.f32 %v2305_v42, %v2045_v57  ;;  %v1299_v14 = vmul.f32 %v963_v2, %v2050_v59  ;;  %v2532_v28 = vld [vmem:[#allocation3_spill] sm:$0xff]  ;;  %v2328_v42 = vpop.permute.xlu1 %1062 }
 0x100   : > { %v909_v36 = vadd.f32 %v907_v1, %v865_v63  ;;  %v1249_v13 = vmul.f32 %v1247_v23, %v858_v41  ;;  %v1269_v12 = vadd.f32 %v1267_v44, %v1263_v62  ;;  %v1285_v6 = vadd.f32 %v2206_v9, %v1277_v48  ;;  %v954_v38 = vld [vmem:[#allocation2 + $0xf] sm:$0xff]  ;;  %2533 = vst [vmem:[#allocation26_spill] sm:$0xff] %v2328_v42  ;;  %v2332_v9 = vld [vmem:[#allocation2 + $0x3b] sm:$0xff] }
 0x101   : > { %v908_v34 = vmul.f32 %v2531_v21, %v898_v26  ;;  %v1311_v4 = vmul.f32 %v1309_v29, %v2054_v61  ;;  %v1117_v35 = vmul.f32 %v2532_v28, %v2238_v18  ;;  %v1268_v37 = vmul.f32 %v1266_v51, %v2035_v52  ;;  %v2534_v23 = vld [vmem:[#allocation27_spill] sm:$0xff] }
 0x102   : > { %v949_v2 = vmul.f32 %v943_v60, %v939_v24  ;;  %v1271_v63 = vmul.f32 %v1269_v12, %v2068_v7  ;;  %v1291_v41 = vadd.f32 %v1289_v25, %v1285_v6  ;;  %v918_v1 = vmul.f32 %v2041_v55, %v912_v43  ;;  %v2535_v29 = vld [vmem:[#allocation15_spill] sm:$0xff]  ;;  %v1288_v7 = vld [vmem:[#allocation2 + $0x3d] sm:$0xff]  ;;  %v2536_v55 = vld [vmem:[#allocation14_spill] sm:$0xff] }
 0x103   : > { %v2334_v48 = vadd.f32 %v1096_v15, %v1088_v17  ;;  %v991_v26 = vmul.f32 %v2257_v39, %v981_v27  ;;  %v1307_v62 = vadd.f32 %v2534_v23, %v1299_v14  ;;  %v1270_v18 = vadd.f32 %v1268_v37, %v2214_v16  ;;  %v1310_v25 = vld [vmem:[#allocation2 + $0x3f] sm:$0xff] }
 0x104   : > { %v951_v52 = vadd.f32 %v949_v2, %v909_v36  ;;  %v1273_v44 = vadd.f32 %v1271_v63, %v1249_v13  ;;  %v930_v42 = vadd.f32 %v2535_v29, %v918_v1  ;;  %v960_v24 = vmul.f32 %v2050_v59, %v954_v38  ;;  %v2537_v16 = vld [vmem:[#allocation16_spill] sm:$0xff]  ;;  %v2538_v38 = vld [vmem:[#allocation5_spill] sm:$0xff] }
 0x105   : > { %v1313_v12 = vadd.f32 %v1311_v4, %v1307_v62  ;;  %v1129_v6 = vadd.f32 %v2536_v55, %v1117_v35  ;;  %v1387_v17 = vmul.f32 %v1266_v51, %v2072_v10  ;;  %v1246_v15 = vmul.f32 %v2332_v9, %v2027_v47  ;;  %v2352_v51 = vpop.permute.xlu1 %1104  ;;  %v2539_v63 = vld [vmem:[#allocation24_spill] sm:$0xff]  ;;  %v2541_v23 = vld [vmem:[#allocation25_spill] sm:$0xff]  ;;  %v2543_v62 = vld [vmem:[#allocation10_spill] sm:$0xff] }
 0x106   : > { %v1293_v27 = vmul.f32 %v1291_v41, %v943_v60  ;;  %v940_v14 = vadd.f32 %v2217_v30, %v930_v42  ;;  %v972_v36 = vadd.f32 %v2537_v16, %v960_v24  ;;  %v1272_v13 = vmul.f32 %v1270_v18, %v2531_v21  ;;  %v2540_v42 = vld [vmem:[#allocation29_spill] sm:$0xff]  ;;  %v989_v24 = vpop.permute.xlu0 %988  ;;  %v2548_v16 = vld [vmem:[#allocation12_spill] sm:$0xff] }
 0x107   : > { %v1248_v37 = vadd.f32 %v1246_v15, %v2229_v5  ;;  %v1290_v59 = vmul.f32 %v1288_v7, %v2045_v57  ;;  %v1312_v4 = vmul.f32 %v1310_v25, %v2054_v61  ;;  %v1159_v35 = vmul.f32 %v2538_v38, %v912_v43  ;;  %v1027_v57 = vld [vmem:[#allocation2 + $0x9] sm:$0xff]  ;;  %v2546_v25 = vld [vmem:[#allocation8_spill] sm:$0xff]  ;;  %v2547_v55 = vld [vmem:[#allocation9_spill] sm:$0xff] }
 0x108   : > { %v910_v2 = vadd.f32 %v908_v34, %v866_v8  ;;  %v1368_v47 = vadd.f32 %v1366_v46, %v2539_v63  ;;  %v993_v60 = vadd.f32 %v991_v26, %v951_v52  ;;  %v1295_v41 = vadd.f32 %v1293_v27, %v1273_v44  ;;  %v2542_v8 = vld [vmem:[#allocation18_spill] sm:$0xff]  ;;  %v2544_v26 = vld [vmem:[#allocation28_spill] sm:$0xff]  ;;  %v2545_v52 = vld [vmem:[#allocation31_spill] sm:$0xff] }
 0x109   : > { %v1315_v30 = vmul.f32 %v1313_v12, %v2257_v39  ;;  %v982_v1 = vadd.f32 %v2540_v42, %v972_v36  ;;  %v1250_v21 = vmul.f32 %v1248_v37, %v2289_v58  ;;  %v1292_v5 = vadd.f32 %v1290_v59, %v2231_v20  ;;  %v1143_v37 = vpop.permute.xlu1 %1142  ;;  %v2552_v63 = vld [vmem:[#allocation11_spill] sm:$0xff]  ;;  %v2554_v42 = vld [vmem:[#allocation13_spill] sm:$0xff] }
 0x10a   : > { %v950_v61 = vmul.f32 %v2541_v23, %v940_v14  ;;  %v1314_v43 = vadd.f32 %v1312_v4, %v2243_v45  ;;  %v1171_v34 = vadd.f32 %v2542_v8, %v1159_v35  ;;  %v1013_v46 = vadd.f32 %v2543_v62, %v2249_v40  ;;  %v1351_v45 = vld [vmem:[#allocation2 + $0x39] sm:$0xff]  ;;  %v2551_v4 = vld [vmem:[#allocation19_spill] sm:$0xff] }
 0x10b   : > { %v1139_v18 = vadd.f32 %v2544_v26, %v1129_v6  ;;  %v1389_v39 = vadd.f32 %v1387_v17, %v2545_v52  ;;  %v1274_v44 = vadd.f32 %v1272_v13, %v1250_v21  ;;  %v1294_v29 = vmul.f32 %v1292_v5, %v2541_v23  ;;  %v2549_v40 = vld [vmem:[#allocation33_spill] sm:$0xff]  ;;  %v2550_v13 = vld [vmem:[#allocation32_spill] sm:$0xff] }
 0x10c   : > { %v1317_v58 = vadd.f32 %v1315_v30, %v1295_v41  ;;  %v952_v20 = vadd.f32 %v950_v61, %v910_v2  ;;  %v1404_v12 = vmul.f32 %v1288_v7, %v2546_v25  ;;  %v1033_v15 = vmul.f32 %v2547_v55, %v1027_v57  ;;  %v2553_v41 = vld [vmem:[#allocation22_spill] sm:$0xff]  ;;  %v2555_v57 = vld [vmem:[#allocation23_spill] sm:$0xff] }
 0x10d   : > { %v992_v27 = vmul.f32 %v989_v24, %v982_v1  ;;  %v1296_v14 = vadd.f32 %v1294_v29, %v1274_v44  ;;  %v1023_v36 = vadd.f32 %v2548_v16, %v1013_v46  ;;  %v1075_v6 = vmul.f32 %v2037_v53, %v2549_v40  ;;  %v2556_v61 = vld [vmem:[#allocation6_spill] sm:$0xff]  ;;  %v1028_v52 = vld [vmem:[#allocation2 + $0x11] sm:$0xff] }
 0x10e   : > { %v1316_v17 = vmul.f32 %v1314_v43, %v989_v24  ;;  %v1181_v59 = vadd.f32 %v2550_v13, %v1171_v34  ;;  %v1045_v35 = vadd.f32 %v2551_v4, %v1033_v15  ;;  %v1347_v2 = vmul.f32 %v2269_v22, %v2552_v63  ;;  %v1038_v44 = vld [vmem:[#allocation2 + $0x21] sm:$0xff]  ;;  %v1101_v24 = vpop.permute.xlu0 %1100  ;;  %v2561_v13 = vld [vmem:[#allocation7_spill] sm:$0xff] }
 0x10f   : > { %v1025_v7 = vadd.f32 %v1023_v36, %v993_v60  ;;  %v1087_v30 = vadd.f32 %v2553_v41, %v1075_v6  ;;  %v1335_v1 = vadd.f32 %v2297_v50, %v2554_v42  ;;  %v1353_v21 = vmul.f32 %v1351_v45, %v2086_v19  ;;  %v2557_v16 = vld [vmem:[#allocation34_spill] sm:$0xff]  ;;  %v2562_v4 = vld [vmem:[#allocation37_spill] sm:$0xff] }
 0x110   : > { %v1055_v5 = vadd.f32 %v2276_v0, %v1045_v35  ;;  %v1349_v23 = vadd.f32 %v1347_v2, %v2555_v57  ;;  %v1361_v43 = vmul.f32 %v2037_v53, %v2556_v61  ;;  %v1365_v8 = vmul.f32 %v2039_v54, %v2125_v49  ;;  %v2563_v2 = vld [vmem:[#allocation20_spill] sm:$0xff] }
 0x111   : > { %v994_v34 = vadd.f32 %v992_v27, %v952_v20  ;;  %v1318_v22 = vadd.f32 %v1316_v17, %v1296_v14  ;;  %v1097_v60 = vadd.f32 %v2287_v56, %v1087_v30  ;;  %v1370_v62 = vmul.f32 %v2332_v9, %v2060_v3  ;;  %v1185_v56 = vpop.permute.xlu1 %1184 }
 0x112   : > { %v1065_v50 = vmul.f32 %v2299_v11, %v1055_v5  ;;  %v1337_v46 = vadd.f32 %v1335_v1, %v1317_v58  ;;  %v1355_v26 = vadd.f32 %v1353_v21, %v1349_v23  ;;  %v1367_v0 = vadd.f32 %v1365_v8, %v1361_v43  ;;  %v1048_v58 = vld [vmem:[#allocation2 + $0x31] sm:$0xff]  ;;  %v1352_v5 = vld [vmem:[#allocation2 + $0x41] sm:$0xff] }
 0x113   : > { %v1108_v53 = vmul.f32 %v2352_v51, %v2334_v48  ;;  %v2393_v29 = vadd.f32 %v2309_v32, %v1368_v47  ;;  %v1149_v54 = vmul.f32 %v1143_v37, %v1139_v18  ;;  %v1391_v49 = vmul.f32 %v1389_v39, %v1143_v37  ;;  %v2558_v47 = vld [vmem:[#allocation35_spill] sm:$0xff]  ;;  %v2559_v37 = vld [vmem:[#allocation30_spill] sm:$0xff]  ;;  %v2565_v1 = vld [vmem:[#allocation36_spill] sm:$0xff] }
 0x114   : > { %v1067_v20 = vadd.f32 %v1065_v50, %v1025_v7  ;;  %v1107_v15 = vmul.f32 %v1101_v24, %v1097_v60  ;;  %v1357_v3 = vmul.f32 %v1355_v26, %v2299_v11  ;;  %v1372_v9 = vadd.f32 %v1370_v62, %v1367_v0  ;;  %v2564_v7 = vld [vmem:[#allocation4_spill] sm:$0xff]  ;;  %v1386_v50 = vld [vmem:[#allocation2 + $0x44] sm:$0xff]  ;;  %v1147_v26 = vpop.permute.xlu0 %1146 }
 0x115   : > { %v1191_v45 = vmul.f32 %v1185_v56, %v1181_v59  ;;  %v1406_v27 = vadd.f32 %v1404_v12, %v2264_v33  ;;  %v1034_v14 = vmul.f32 %v2547_v55, %v1028_v52  ;;  %v1044_v48 = vmul.f32 %v2552_v63, %v1038_v44  ;;  %v2560_v12 = vld [vmem:[#allocation21_spill] sm:$0xff] }
 0x116   : > { %v1026_v32 = vadd.f32 %v2557_v16, %v994_v34  ;;  %v1338_v18 = vadd.f32 %v2558_v47, %v1318_v22  ;;  %v1109_v39 = vadd.f32 %v1107_v15, %v1067_v20  ;;  %v1359_v36 = vadd.f32 %v1357_v3, %v1337_v46  ;;  %v2566_v34 = vld [vmem:[#allocation26_spill] sm:$0xff]  ;;  %v1189_v3 = vpop.permute.xlu1 %1188 }
 0x117   : > { %v1160_v40 = vmul.f32 %v2538_v38, %v2225_v31  ;;  %v1046_v6 = vadd.f32 %v1044_v48, %v1034_v14  ;;  %v1054_v11 = vmul.f32 %v2086_v19, %v1048_v58  ;;  %v1118_v17 = vmul.f32 %v2532_v28, %v2559_v37 }
 0x118   : > { %v1374_v33 = vmul.f32 %v1372_v9, %v1101_v24  ;;  %v1170_v59 = vmul.f32 %v2561_v13, %v2560_v12  ;;  %v1180_v35 = vmul.f32 %v2562_v4, %v2546_v25  ;;  %v1128_v41 = vmul.f32 %v2564_v7, %v2563_v2 }
 0x119   : > { %v1151_v30 = vadd.f32 %v1149_v54, %v1109_v39  ;;  %v1400_v31 = vmul.f32 %v2562_v4, %v2561_v13  ;;  %v1056_v42 = vadd.f32 %v1054_v11, %v1046_v6  ;;  %v1138_v21 = vmul.f32 %v2565_v1, %v2072_v10  ;;  %v1403_v54 = vld [vmem:[#allocation2 + $0x45] sm:$0xff] }
 0x11a   : > { %v1376_v57 = vadd.f32 %v1374_v33, %v1359_v36  ;;  %v1130_v23 = vadd.f32 %v1128_v41, %v1118_v17  ;;  %v1342_v61 = vmul.f32 %v1038_v44, %v2547_v55  ;;  %v1348_v43 = vmul.f32 %v1048_v58, %v2552_v63 }
 0x11b   : > { %v1172_v8 = vadd.f32 %v1170_v59, %v1160_v40  ;;  %v1066_v22 = vmul.f32 %v2566_v34, %v1056_v42  ;;  %v1379_v60 = vmul.f32 %v2532_v28, %v2563_v2  ;;  %v1383_v62 = vmul.f32 %v2565_v1, %v2564_v7  ;;  %v1655_v28 = vld [vmem:[%s2461_s6] ss:$0 sm:$0xff] }
 0x11c   : > { %v1396_v46 = vmul.f32 %v2538_v38, %v2560_v12  ;;  %v1140_v0 = vadd.f32 %v1138_v21, %v1130_v23  ;;  %v1350_v52 = vadd.f32 %v1348_v43, %v1342_v61  ;;  %v1354_v55 = vmul.f32 %v1352_v5, %v2086_v19 }
 0x11d   : > { %v1193_v44 = vadd.f32 %v1191_v45, %v1151_v30  ;;  %v1182_v63 = vadd.f32 %v1180_v35, %v1172_v8  ;;  %v1068_v24 = vadd.f32 %v1066_v22, %v1026_v32  ;;  %v1385_v20 = vadd.f32 %v1383_v62, %v1379_v60 }
 0x11e   : > { %v1393_v15 = vadd.f32 %v1391_v49, %v1376_v57  ;;  %v1402_v9 = vadd.f32 %v1400_v31, %v1396_v46  ;;  %v1356_v58 = vadd.f32 %v1354_v55, %v1350_v52  ;;  %v1388_v38 = vmul.f32 %v1386_v50, %v2072_v10 }
 0x11f   : > { %v1110_v14 = vadd.f32 %v1108_v53, %v1068_v24  ;;  %v1150_v48 = vmul.f32 %v1147_v26, %v1140_v0  ;;  %v1408_v16 = vmul.f32 %v1406_v27, %v1185_v56  ;;  %v1405_v19 = vmul.f32 %v1403_v54, %v2546_v25 }
 0x120   : > { %v1358_v45 = vmul.f32 %v1356_v58, %v2566_v34  ;;  %v1390_v32 = vadd.f32 %v1388_v38, %v1385_v20  ;;  %v1201_v47 = vadd.f32 %v1655_v28, %v1193_v44  ;;  %v1192_v39 = vmul.f32 %v1189_v3, %v1182_v63 }
 0x121   : > { %v1152_v36 = vadd.f32 %v1150_v48, %v1110_v14  ;;  %v1375_v49 = vmul.f32 %v2393_v29, %v2352_v51  ;;  %v1410_v40 = vadd.f32 %v1408_v16, %v1393_v15  ;;  %v1407_v6 = vadd.f32 %v1405_v19, %v1402_v9 }
 0x122   : > { %v1360_v11 = vadd.f32 %v1358_v45, %v1338_v18  ;;  %v1392_v53 = vmul.f32 %v1390_v32, %v1147_v26  ;;  %v1221_v17 = vmul.f32 %v1201_v47, %v1201_v47 }
 0x123   : > { %v1194_v37 = vadd.f32 %v1192_v39, %v1152_v36  ;;  %v1412_v25 = vadd.f32 %v1655_v28, %v1410_v40  ;;  %v1409_v27 = vmul.f32 %v1407_v6, %v1189_v3 }
 0x124   : > { %v1377_v10 = vadd.f32 %v1375_v49, %v1360_v11 }
 0x125   : > { %v1202_v56 = vadd.f32 %v1655_v28, %v1194_v37  ;;  %v1432_v4 = vmul.f32 %v1412_v25, %v1412_v25 }
 0x126   : > { %v1394_v33 = vadd.f32 %v1392_v53, %v1377_v10 }
 0x127   : > { %v1669_v12 = vpack.c.bf16 %v1202_v56, %v1201_v47  ;;  %v1213_v13 = vadd.f32 %v1202_v56, %v1201_v47  ;;  %v1222_v59 = vmul.f32 %v1202_v56, %v1202_v56 }
 0x128   : > { %v1411_v51 = vadd.f32 %v1409_v27, %v1394_v33 }
 0x129   : > { %1670 = vst [vmem:[%s511_s16] sm:$0xff] %v1669_v12   ;;  %v1214_v29 = vrot.slane %v1213_v13, 4  ;;  %v1223_v18 = vadd.f32 %v1222_v59, %v1221_v17 }
 0x12a   : > { %v1413_v35 = vadd.f32 %v1655_v28, %v1411_v51 }
 0x12b   : > { %v1215_v2 = vadd.f32 %v1214_v29, %v1213_v13  ;;  %v1224_v7 = vrot.slane %v1223_v18, 4 }
 0x12c   : > { %v1674_v41 = vpack.c.bf16 %v1413_v35, %v1412_v25  ;;  %v1424_v30 = vadd.f32 %v1413_v35, %v1412_v25  ;;  %v1433_v31 = vmul.f32 %v1413_v35, %v1413_v35 }
 0x12d   : > { %v1216_v42 = vrot.slane %v1215_v2, 2  ;;  %v1225_v1 = vadd.f32 %v1224_v7, %v1223_v18 }
 0x12e   : > { %1676 = vst [vmem:[%s511_s16 + $0x8] sm:$0xff] %v1674_v41   ;;  %v1425_v21 = vrot.slane %v1424_v30, 4  ;;  %v1434_v5 = vadd.f32 %v1433_v31, %v1432_v4 }
 0x12f   : > { %v1226_v57 = vrot.slane %v1225_v1, 2  ;;  %v1217_v23 = vadd.f32 %v1216_v42, %v1215_v2 }
 0x130   : > { %v1426_v61 = vadd.f32 %v1425_v21, %v1424_v30  ;;  %v1435_v43 = vrot.slane %v1434_v5, 4 }
 0x131   : > { %v1227_v8 = vadd.f32 %v1226_v57, %v1225_v1  ;;  %v1218_v60 = vrot.slane %v1217_v23, 1 }
 0x132   : > { %v1427_v34 = vrot.slane %v1426_v61, 2  ;;  %v1436_v22 = vadd.f32 %v1435_v43, %v1434_v5 }
 0x133   : > { %v1228_v46 = vrot.slane %v1227_v8, 1  ;;  %v1219_v52 = vadd.f32 %v1218_v60, %v1217_v23 }
 0x134   : > { %v1428_v62 = vadd.f32 %v1427_v34, %v1426_v61  ;;  %v1437_v50 = vrot.slane %v1436_v22, 2 }
 0x135   : > { %v1229_v63 = vadd.f32 %v1228_v46, %v1227_v8 }
 0x136   : > { %v1429_v26 = vrot.slane %v1428_v62, 1  ;;  %v1438_v0 = vadd.f32 %v1437_v50, %v1436_v22 }
 0x138   : > { %v1430_v55 = vadd.f32 %v1429_v26, %v1428_v62  ;;  %v1439_v44 = vrot.slane %v1438_v0, 1 }
 0x13a   : > { %v1431_v54 = vadd.f32 %v1430_v55, %v1219_v52  ;;  %v1440_v24 = vadd.f32 %v1439_v44, %v1438_v0 }
 0x13c   : > { %v1441_v20 = vadd.f32 %v1440_v24, %v1229_v63  ;;  %1442 = vst [vmem:[%s1966_s28] sm:$0x1] %v1431_v54 }
 0x13e   : > { %1443 = vst [vmem:[%s1966_s28 + $0x1] sm:$0x1] %v1441_v20 }
 0x13f PF: > { %s20_s13 = sadd.s32 1, %s1815_s13   ;;  %s2567_s30 = smov %s1807_s11 }
 0x140   : > { %p17_p0 = scmp.ge.s32.totalorder %s20_s13, 6   ;;  %s2568_s10 = smov %s1811_s12 }
 0x141   : > { %s2569_s11 = smov %s2572_s14  ;;  %s2570_s12 = smov %s2576_s15 }
 0x142   :  { %19 = sbr.rel (!%p17_p0) target bundleno = 3 (0x3), region = 100 }

</bundles_post_ra>
